<compile_context>
chip_gen: v6e
topology: v6e:2x2x1
jax: 0.10.0
libtpu: 0.0.40
codegen_flags: <defaults>
</compile_context>

<pallas_src>
import math

import jax
import jax.numpy as jnp
from jax import lax
from jax.experimental import pallas as pl
from jax.experimental.pallas import tpu as pltpu


def _source_coords(out_size, in_size, scale, align_corners):
    """PyTorch-style 1-D source coordinates + linear interpolation weights."""
    if align_corners:
        # PyTorch: step = (in-1)/(out-1); step = 0 when out_size == 1.
        step = (in_size - 1) / (out_size - 1) if out_size > 1 else 0.0
        src = jnp.arange(out_size, dtype=jnp.float32) * step
    else:
        # PyTorch: src = (dst + 0.5) / scale - 0.5, clamped at 0.
        src = (jnp.arange(out_size, dtype=jnp.float32) + 0.5) / scale - 0.5
        src = jnp.maximum(src, 0.0)
    i0 = jnp.clip(jnp.floor(src).astype(jnp.int32), 0, in_size - 1)
    i1 = jnp.minimum(i0 + 1, in_size - 1)
    lam1 = src - i0.astype(jnp.float32)
    lam0 = 1.0 - lam1
    return i0, i1, lam0, lam1


def _interp_matrix(out_size, in_size, scale, align_corners):
    """Dense (out_size, in_size) 1-D bilinear interpolation matrix."""
    i0, i1, lam0, lam1 = _source_coords(out_size, in_size, scale, align_corners)
    rows = jnp.arange(out_size)
    a = jnp.zeros((out_size, in_size), jnp.float32)
    a = a.at[rows, i0].add(lam0)
    a = a.at[rows, i1].add(lam1)   # i0 == i1 at the border -> weights sum to 1
    return a


def interp_kernel(ah_ref, awt_ref, x_ref, out_ref):
    # ah_ref : (t_ho, H)          height-interp tile of A_h
    # awt_ref: (W, Wo)            width-interp matrix A_w^T (small, shared)
    # x_ref  : (Nb, C, H, W)      Nb input images, native NCHW layout
    # out_ref: (Nb, C, t_ho, Wo)  native NCHW output tile
    nb, c, h, w = x_ref.shape
    t_ho = ah_ref.shape[0]
    wo = awt_ref.shape[1]
    b = nb * c

    x = x_ref[...].reshape(b, h, w)                       # fold N*C (leading dims)

    # Height pass: batched MXU matmul over the folded N*C axis, f32 accumulation.
    ah = jnp.broadcast_to(ah_ref[...][None, :, :], (b, t_ho, h))
    y = lax.dot_general(
        ah, x,
        dimension_numbers=(((2,), (1,)), ((0,), (0,))),
        precision=lax.Precision.HIGHEST,
        preferred_element_type=jnp.float32)               # (b, t_ho, w)

    # Width pass: fold (N*C, t_ho) onto sublanes -> one plain MXU matmul against
    # the small (W, Wo) weight (no kron(A_w^T, I_C) C^2 blow-up).
    y = y.reshape(b * t_ho, w).astype(awt_ref.dtype)
    z = jnp.dot(y, awt_ref[...],
                precision=lax.Precision.HIGHEST,
                preferred_element_type=jnp.float32)       # (b*t_ho, wo)

    out_ref[...] = z.reshape(nb, c, t_ho, wo).astype(out_ref.dtype)


def _pick_ho_tile(ho, max_tile=256):
    """Output-height tile: whole Ho if small, else a divisor that keeps the
    (8, 128) block constraint happy."""
    if ho <= max_tile:
        return ho
    for t in range(max_tile, 7, -1):
        if ho % t == 0 and t % 8 == 0:
            return t
    return ho   # fallback: untiled height (rare, non-8-divisible Ho)


def _pick_batch_tile(n, per_image_io_bytes, target_bytes=2 << 20):
    """Images per grid step: amortize the ~0.35us per-step overhead while keeping
    the double-buffered per-step footprint a few MiB (fits v5e/v6e/v7x defaults)."""
    cap = max(1, min(n, target_bytes // max(per_image_io_bytes, 1)))
    for d in range(int(cap), 0, -1):
        if n % d == 0:
            return d
    return 1


def interpolate(x, scale_factor, mode="bilinear", align_corners=False):
    """Forward pass equivalent to the PyTorch `Interpolate` module (bilinear)."""
    if mode != "bilinear":
        # TODO(synk): only 'bilinear' is implemented in-kernel; 'nearest' /
        # 'bicubic' / 'area' need their own 1-D weight construction.
        raise NotImplementedError(f"mode={mode!r} not supported")

    n, c, h, w = x.shape
    ho = int(math.floor(h * scale_factor))
    wo = int(math.floor(w * scale_factor))
    itemsize = jnp.dtype(x.dtype).itemsize

    # Interp weights in the data dtype (bf16 data -> native MXU bf16 path);
    # in-kernel accumulation stays f32.
    w_dtype = x.dtype
    a_h = _interp_matrix(ho, h, scale_factor, align_corners).astype(w_dtype)
    a_wt = _interp_matrix(wo, w, scale_factor, align_corners).T.astype(w_dtype)

    t_ho = _pick_ho_tile(ho)
    nb = _pick_batch_tile(n, c * (h * w + ho * wo) * itemsize)
    grid = (n // nb, ho // t_ho)

    cost = pl.CostEstimate(
        flops=int(2 * n * c * ho * w * (h + wo)),
        transcendentals=0,
        bytes_accessed=int((n * c * h * w + n * c * ho * wo) * itemsize
                           + (ho * h + w * wo) * itemsize),
    )

    out = pl.pallas_call(
        interp_kernel,
        out_shape=jax.ShapeDtypeStruct((n, c, ho, wo), x.dtype),
        grid_spec=pltpu.PrefetchScalarGridSpec(
            num_scalar_prefetch=0,
            grid=grid,
            in_specs=[
                # Tiny resident weights (a few KiB each; no kron blow-up).
                pl.BlockSpec((t_ho, h), lambda b, i: (i, 0)),
                pl.BlockSpec((w, wo), lambda b, i: (0, 0)),
                # Nb whole NCHW images per step (full H is needed by any Ho tile).
                pl.BlockSpec((nb, c, h, w), lambda b, i: (b, 0, 0, 0)),
            ],
            out_specs=pl.BlockSpec((nb, c, t_ho, wo),
                                   lambda b, i: (b, 0, i, 0)),
        ),
        compiler_params=pltpu.CompilerParams(
            dimension_semantics=("parallel", "parallel")),
        cost_estimate=cost,
    )(a_h, a_wt, x)
    return out


def interpolate_ref(x, scale_factor, align_corners=False):
    """Pure-JAX gather-based reference (matches PyTorch bilinear interpolate),
    computed in f32."""
    n, c, h, w = x.shape
    ho = int(math.floor(h * scale_factor))
    wo = int(math.floor(w * scale_factor))
    h0, h1, lh0, lh1 = _source_coords(ho, h, scale_factor, align_corners)
    w0, w1, lw0, lw1 = _source_coords(wo, w, scale_factor, align_corners)
    xf = x.astype(jnp.float32)
    rows = (xf[:, :, h0, :] * lh0[None, None, :, None]
            + xf[:, :, h1, :] * lh1[None, None, :, None])
    out = (rows[:, :, :, w0] * lw0[None, None, None, :]
           + rows[:, :, :, w1] * lw1[None, None, None, :])
    return out


if __name__ == "__main__":
    N, C, H, W = 2, 4, 16, 16
    scale = 2.0

    key = jax.random.PRNGKey(0)
    x = jax.random.normal(key, (N, C, H, W), dtype=jnp.float32)

    # Tolerances are chosen to absorb MXU reduced-precision passes (worst case a
    # few 1e-3 relative) while remaining far below any real interpolation bug,
    # which would show up as O(1) errors.
    for align_corners in (False, True):
        out = jax.block_until_ready(
            interpolate(x, scale, mode="bilinear", align_corners=align_corners))
        ref = interpolate_ref(x, scale, align_corners=align_corners)
        assert out.shape == (N, C, int(H * scale), int(W * scale))
        assert jnp.allclose(out.astype(jnp.float32), ref, atol=2e-2, rtol=2e-2), \
            f"mismatch vs reference (align_corners={align_corners})"

    # bf16 path: native MXU dtype, half the HBM traffic; looser tolerance for
    # bf16 quantization of inputs/intermediates.
    xb = x.astype(jnp.bfloat16)
    outb = jax.block_until_ready(
        interpolate(xb, scale, mode="bilinear", align_corners=False))
    refb = interpolate_ref(x, scale, align_corners=False)
    assert outb.dtype == jnp.bfloat16
    assert jnp.allclose(outb.astype(jnp.float32), refb, atol=6e-2, rtol=6e-2), \
        "bf16 mismatch vs reference"

    print("KERNEL_OK")
</pallas_src>

<mosaic_0001>
module attributes {stable_mosaic.version = 11 : i64} {
  func.func @interp_kernel(%arg0: i32, %arg1: i32, %arg2: memref<32x16xf32, #tpu.memory_space<vmem>>, %arg3: memref<16x32xf32, #tpu.memory_space<vmem>>, %arg4: memref<2x4x16x16xf32, #tpu.memory_space<vmem>>, %arg5: memref<2x4x32x32xf32, #tpu.memory_space<vmem>>) attributes {dimension_semantics = [#tpu.dimension_semantics<parallel>, #tpu.dimension_semantics<parallel>], iteration_bounds = array<i64: 1, 1>, scalar_prefetch = 0 : i64, scratch_operands = 0 : i64, tpu.core_type = #tpu.core_type<tc>, window_params = [{transform_indices = @transform_0, window_bounds = array<i64: 32, 16>}, {pipeline_mode = #tpu.pipeline_mode<synchronous>, transform_indices = @transform_1, window_bounds = array<i64: 16, 32>}, {transform_indices = @transform_2, window_bounds = array<i64: 2, 4, 16, 16>}, {transform_indices = @transform_3, window_bounds = array<i64: 2, 4, 32, 32>}]} {
    %c0 = arith.constant 0 : index
    %c0_0 = arith.constant 0 : index
    %c0_1 = arith.constant 0 : index
    %c0_2 = arith.constant 0 : index
    %0 = vector.load %arg4[%c0, %c0_0, %c0_1, %c0_2] : memref<2x4x16x16xf32, #tpu.memory_space<vmem>>, vector<2x4x16x16xf32>
    %1 = vector.shape_cast %0 : vector<2x4x16x16xf32> to vector<8x16x16xf32>
    %c0_3 = arith.constant 0 : index
    %c0_4 = arith.constant 0 : index
    %2 = vector.load %arg2[%c0_3, %c0_4] : memref<32x16xf32, #tpu.memory_space<vmem>>, vector<32x16xf32>
    %3 = vector.shape_cast %2 : vector<32x16xf32> to vector<1x32x16xf32>
    %4 = vector.shape_cast %3 : vector<1x32x16xf32> to vector<1x32x16xf32>
    %5 = vector.broadcast %4 : vector<1x32x16xf32> to vector<8x32x16xf32>
    %cst = arith.constant dense<0.000000e+00> : vector<8x32x16xf32>
    %6 = tpu.matmul %5, %1, %cst {dimension_numbers = #tpu.dot_dimension_numbers<[2], [1], [1], [2], [0, 0, 0, 1, 1, 2], [0], [0]>, precision = #tpu.contract_precision<fp32>} : vector<8x32x16xf32>, vector<8x16x16xf32>, vector<8x32x16xf32> -> vector<8x32x16xf32>
    %7 = vector.shape_cast %6 : vector<8x32x16xf32> to vector<256x16xf32>
    %c0_5 = arith.constant 0 : index
    %c0_6 = arith.constant 0 : index
    %8 = vector.load %arg3[%c0_5, %c0_6] : memref<16x32xf32, #tpu.memory_space<vmem>>, vector<16x32xf32>
    %cst_7 = arith.constant dense<0.000000e+00> : vector<256x32xf32>
    %9 = tpu.matmul %7, %8, %cst_7 {dimension_numbers = #tpu.dot_dimension_numbers<[1], [0], [0], [1], [0, 0, 1, 1], [], []>, precision = #tpu.contract_precision<fp32>} : vector<256x16xf32>, vector<16x32xf32>, vector<256x32xf32> -> vector<256x32xf32>
    %10 = vector.shape_cast %9 : vector<256x32xf32> to vector<2x4x32x32xf32>
    %c0_8 = arith.constant 0 : index
    %c0_9 = arith.constant 0 : index
    %c0_10 = arith.constant 0 : index
    %c0_11 = arith.constant 0 : index
    %11 = vector.load %arg5[%c0_8, %c0_9, %c0_10, %c0_11] : memref<2x4x32x32xf32, #tpu.memory_space<vmem>>, vector<2x4x32x32xf32>
    tpu.vector_store %arg5[%c0_8, %c0_9, %c0_10, %c0_11], %10 {strides = array<i32>} : memref<2x4x32x32xf32, #tpu.memory_space<vmem>>, vector<2x4x32x32xf32>,
    return
  }
  func.func @transform_0(%arg0: i32, %arg1: i32) -> (i32, i32) {
    %c0_i32 = arith.constant 0 : i32
    %c0_i32_0 = arith.constant 0 : i32
    return %arg1, %c0_i32 : i32, i32
  }
  func.func @transform_1(%arg0: i32, %arg1: i32) -> (i32, i32) {
    %c0_i32 = arith.constant 0 : i32
    %c0_i32_0 = arith.constant 0 : i32
    %c0_i32_1 = arith.constant 0 : i32
    return %c0_i32, %c0_i32_0 : i32, i32
  }
  func.func @transform_2(%arg0: i32, %arg1: i32) -> (i32, i32, i32, i32) {
    %c0_i32 = arith.constant 0 : i32
    %c0_i32_0 = arith.constant 0 : i32
    %c0_i32_1 = arith.constant 0 : i32
    %c0_i32_2 = arith.constant 0 : i32
    return %arg0, %c0_i32, %c0_i32_0, %c0_i32_1 : i32, i32, i32, i32
  }
  func.func @transform_3(%arg0: i32, %arg1: i32) -> (i32, i32, i32, i32) {
    %c0_i32 = arith.constant 0 : i32
    %c0_i32_0 = arith.constant 0 : i32
    %c0_i32_1 = arith.constant 0 : i32
    return %arg0, %c0_i32, %arg1, %c0_i32_0 : i32, i32, i32, i32
  }
}

</mosaic_0001>

<bundles_post_ra>
// kernel: tpu_custom_call.1
= control target key start
LH: loop header
LB: loop body
LE: loop exit
PB: predicated region body
PF: predicated region fallthrough
CT: control target
= control target key end

     0   :  { %8 = vsyncpa [#allocation3], 0  ;;  %s9413_s0 = inlined_call_operand.vmem [shape: f32[32,16], index: 0, kind: input, shape index: {}]   ;;  %s9414_s1 = inlined_call_operand.vmem [shape: f32[16,32], index: 1, kind: input, shape index: {}]   ;;  %s9415_s2 = inlined_call_operand.hbm [shape: f32[2,4,16,16], index: 2, kind: input, shape index: {}]   ;;  %s9416_s3 = inlined_call_operand.hbm [shape: f32[2,4,32,32], index: 3, kind: output, shape index: {}]  }
   0x1   :  { %9 = vsyncpa [#allocation4], 0  ;;  %s8038_s12 = smov [#allocation2]  }
   0x2   :  { %s19_s13 = sshll.u32 %s8038_s12, 4  ;;  %s20_s13 = int_to_ptr.vmem [resolvable:$true] %s19_s13 }
   0x3   :  { %s8002_s14 = scalar_lea.vmem %s20_s13, 2048  ;;  %p8007_p1 = scmp.lt.s32.totalorder %s20_s13, %s20_s13 }
   0x4   :  { %p8003_p0 = scmp.ne.s32.totalorder %s20_s13, %s8002_s14  ;;  %p8008_p2 = scmp.lt.s32.totalorder %s8002_s14, %s8002_s14 }
   0x6   :  { %p8009_p3 = por %p8008_p2, %p8007_p1 }
   0x8   :  { %p8010_p4 = pnand %p8009_p3, %p8003_p0 }
   0xa   :  { %8013 = shalt.err (!%p8010_p4)
}
   0xb   :  { %s8039_s15 = smov 128   ;;  %s8040_s16 = smov 8  }
   0xc   :  { %25 = dma.hbm_to_vmem [thread:$0]  %s9415_s2, 2048, %s20_s13, [#allocation3], %s8039_s15, %s8039_s15, %s8040_s16  }
   0xd   :  { %8034 = dma.done.wait [#allocation3], 2048  }
   0xe   :  { %8035 = vsyncadd [#allocation3], 4294965248  ;;  %vm49_vm0 = vcmask 130048   ;;  %v30_v0 = vld [vmem:[#allocation2 + $0x8] sm:$0xff]  ;;  %v29_v1 = vld [vmem:[#allocation2] sm:$0xff]  ;;  %vm6656_vm1 = vcmask 261120  }
   0xf   :  { %v45_v2 = vld [vmem:[%s9413_s0] sm:$0xff]  ;;  %v8071_v3 = vand.u32 4294901760, %v30_v0  ;;  %v8073_v4 = vand.u32 4294901760, %v29_v1  ;;  %v46_v6 = vld [vmem:[%s9413_s0 + $0x8] sm:$0xff]  ;;  %v47_v7 = vld [vmem:[%s9413_s0 + $0x10] sm:$0xff] }
  0x10   :  { %v51_v5 = vsel %vm49_vm0, %v45_v2, 0  ;;  %v48_v8 = vld [vmem:[%s9413_s0 + $0x18] sm:$0xff]  ;;  %v54_v10 = vsel %vm49_vm0, %v46_v6, 0  ;;  %v57_v11 = vsel %vm49_vm0, %v47_v7, 0  ;;  %v31_v41 = vld [vmem:[#allocation2 + $0x10] sm:$0xff]  ;;  %v34_v52 = vld [vmem:[#allocation2 + $0x28] sm:$0xff] }
  0x11   :  { %v8085_v9 = vand.u32 4294901760, %v51_v5  ;;  %v60_v12 = vsel %vm49_vm0, %v48_v8, 0  ;;  %7198 = vmatprep.subr.mxu0 %v8071_v3  ;;  %v199_v13 = vsub.f32 %v30_v0, %v8071_v3  ;;  %v8092_v14 = vand.u32 4294901760, %v54_v10  ;;  %v32_v31 = vld [vmem:[#allocation2 + $0x18] sm:$0xff]  ;;  %v33_v54 = vld [vmem:[#allocation2 + $0x20] sm:$0xff]  ;;  %v35_v2 = vld [vmem:[#allocation2 + $0x30] sm:$0xff] }
  0x12   :  { %v206_v15 = vsub.f32 %v29_v1, %v8073_v4  ;;  %v8095_v16 = vand.u32 4294901760, %v57_v11  ;;  %7199 = vmatpush3.msra.mxu0 %v8071_v3  ;;  %v8102_v18 = vand.u32 4294901760, %v60_v12  ;;  %v8139_v39 = vand.u32 4294901760, %v32_v31  ;;  %v36_v0 = vld [vmem:[#allocation2 + $0x38] sm:$0xff] }
  0x13   :  { %v8099_v17 = vsub.f32 %v51_v5, %v8085_v9  ;;  %7212 = vmatprep.mubr.f32.mxu1 %v8085_v9  ;;  %7200 = vmatprep.subr.mxu0 %v8073_v4  ;;  %v200_v19 = vand.u32 4294901760, %v199_v13  ;;  %v8106_v20 = vsub.f32 %v54_v10, %v8092_v14  ;;  %v8150_v44 = vand.u32 4294901760, %v31_v41 }
  0x14   :  { %v207_v21 = vand.u32 4294901760, %v206_v15  ;;  %v8109_v22 = vsub.f32 %v57_v11, %v8095_v16  ;;  %7201 = vmatpush3.msra.mxu0 %v8073_v4  ;;  %v8116_v24 = vsub.f32 %v60_v12, %v8102_v18  ;;  %v787_v43 = vsub.f32 %v32_v31, %v8139_v39 }
  0x15   :  { %v8113_v23 = vand.u32 4294901760, %v8099_v17  ;;  %v201_v25 = vsub.f32 %v199_v13, %v200_v19  ;;  %v8119_v26 = vand.u32 4294901760, %v8106_v20  ;;  %7218 = vmatprep.subr.mxu0 %v199_v13  ;;  %v794_v46 = vsub.f32 %v31_v41, %v8150_v44  ;;  %v39_v41 = vld [vmem:[#allocation2 + $0x50] sm:$0xff] }
  0x16   :  { %v208_v27 = vsub.f32 %v206_v15, %v207_v21  ;;  %v8122_v28 = vand.u32 4294901760, %v8109_v22  ;;  %v8127_v30 = vand.u32 4294901760, %v8116_v24  ;;  %v8158_v45 = vand.u32 4294901760, %v787_v43 }
  0x17   :  { %v132_v29 = vsub.f32 %v8099_v17, %v8113_v23  ;;  %v202_v32 = vand.u32 4294901760, %v201_v25  ;;  %v142_v33 = vsub.f32 %v8106_v20, %v8119_v26  ;;  %v8168_v48 = vand.u32 4294901760, %v794_v46 }
  0x18   :  { %v209_v34 = vand.u32 4294901760, %v208_v27  ;;  %v152_v35 = vsub.f32 %v8109_v22, %v8122_v28  ;;  %v162_v37 = vsub.f32 %v8116_v24, %v8127_v30  ;;  %v789_v47 = vsub.f32 %v787_v43, %v8158_v45 }
  0x19   :  { %v8133_v36 = vand.u32 4294901760, %v132_v29  ;;  %7208 = vmatprep.subr.mxu1 %v202_v32  ;;  %v8137_v38 = vand.u32 4294901760, %v142_v33  ;;  %v796_v50 = vsub.f32 %v794_v46, %v8168_v48  ;;  %v8190_v53 = vand.u32 4294901760, %v34_v52 }
  0x1a   :  { %7209 = vmatpush3.msra.mxu1 %v202_v32  ;;  %v8142_v40 = vand.u32 4294901760, %v152_v35  ;;  %v8145_v42 = vand.u32 4294901760, %v162_v37  ;;  %v790_v49 = vand.u32 4294901760, %v789_v47  ;;  %v8198_v56 = vand.u32 4294901760, %v33_v54  ;;  %v40_v37 = vld [vmem:[#allocation2 + $0x58] sm:$0xff] }
  0x1b   :  { %7202 = vmatprep.mubr.f32.mxu0 %v8133_v36  ;;  %7210 = vmatprep.subr.mxu1 %v209_v34  ;;  %v797_v51 = vand.u32 4294901760, %v796_v50  ;;  %v1375_v55 = vsub.f32 %v34_v52, %v8190_v53  ;;  %v8242_v1 = vand.u32 4294901760, %v36_v0  ;;  %v42_v52 = vld [vmem:[#allocation2 + $0x68] sm:$0xff] }
  0x1c   :  { %7203 = vmatmul.mubr.f32.vlgmr.msra.gmra.mxu0 %v8137_v38  ;;  %7211 = vmatpush3.msra.mxu1 %v209_v34  ;;  %v1382_v58 = vsub.f32 %v33_v54, %v8198_v56  ;;  %v41_v54 = vld [vmem:[#allocation2 + $0x60] sm:$0xff] }
  0x1d   :  { %7219 = vmatpush3.msra.mxu0 %v199_v13  ;;  %7213 = vmatmul.mubr.f32.vlgmr.msra.gmra.mxu1 %v8092_v14  ;;  %v8206_v57 = vand.u32 4294901760, %v1375_v55  ;;  %v38_v13 = vld [vmem:[#allocation2 + $0x48] sm:$0xff] }
  0x1e   :  { %7228 = vmatprep.subr.mxu1 %v8071_v3  ;;  %7205 = vmatprep.mubr.f32.mxu0 %v8142_v40  ;;  %v8218_v60 = vand.u32 4294901760, %v1382_v58 }
  0x1f   :  { %7229 = vmatpush3.msra.mxu1 %v8071_v3  ;;  %7220 = vmatprep.subr.mxu0 %v206_v15  ;;  %v1377_v59 = vsub.f32 %v1375_v55, %v8206_v57 }
  0x20   :  { %7206 = vmatmul.mubr.f32.gmra.mxu0 %v8145_v42  ;;  %7215 = vmatprep.mubr.f32.mxu1 %v8095_v16  ;;  %v1384_v62 = vsub.f32 %v1382_v58, %v8218_v60 }
  0x21   :  { %7221 = vmatpush3.msra.mxu0 %v206_v15  ;;  %7216 = vmatmul.mubr.f32.gmra.mxu1 %v8102_v18  ;;  %v1378_v61 = vand.u32 4294901760, %v1377_v59  ;;  %v8294_v15 = vand.u32 4294901760, %v38_v13 }
  0x22   :  { %7230 = vmatprep.subr.mxu1 %v8073_v4  ;;  %7222 = vmatprep.mubr.f32.mxu0 %v8099_v17  ;;  %v1385_v63 = vand.u32 4294901760, %v1384_v62 }
  0x23   :  { %7231 = vmatpush3.msra.mxu1 %v8073_v4  ;;  %7238 = vmatprep.subr.mxu0 %v200_v19 }
  0x24   :  { %7223 = vmatmul.mubr.f32.vlgmr.msra.gmra.mxu0 %v8106_v20  ;;  %7232 = vmatprep.mubr.f32.mxu1 %v8113_v23 }
  0x25   :  { %7239 = vmatpush3.msra.mxu0 %v200_v19  ;;  %7233 = vmatmul.mubr.f32.vlgmr.msra.gmra.mxu1 %v8119_v26  ;;  %v37_v19 = vld [vmem:[#allocation2 + $0x40] sm:$0xff] }
  0x26   :  { %7248 = vmatprep.subr.mxu1 %v8071_v3  ;;  %7225 = vmatprep.mubr.f32.mxu0 %v8109_v22  ;;  %v8302_v25 = vand.u32 4294901760, %v37_v19 }
  0x27   :  { %7249 = vmatpush3.msra.mxu1 %v8071_v3  ;;  %7240 = vmatprep.subr.mxu0 %v207_v21  ;;  %v1963_v3 = vsub.f32 %v36_v0, %v8242_v1  ;;  %v44_v0 = vld [vmem:[#allocation2 + $0x78] sm:$0xff] }
  0x28   :  { %7226 = vmatmul.mubr.f32.gmra.mxu0 %v8116_v24  ;;  %7235 = vmatprep.mubr.f32.mxu1 %v8122_v28  ;;  %v2558_v29 = vsub.f32 %v37_v19, %v8302_v25  ;;  %v4766_v19 = vld [vmem:[%s9414_s1] sm:$0xff] }
  0x29   :  { %7241 = vmatpush3.msra.mxu0 %v207_v21  ;;  %7236 = vmatmul.mubr.f32.gmra.mxu1 %v8127_v30  ;;  %v8258_v5 = vand.u32 4294901760, %v1963_v3  ;;  %v2551_v21 = vsub.f32 %v38_v13, %v8294_v15  ;;  %v4767_v13 = vld [vmem:[%s9414_s1 + $0x8] sm:$0xff]  ;;  %s8041_s1 = smov [#allocation5]  }
  0x2a   :  { %7250 = vmatprep.subr.mxu1 %v8073_v4  ;;  %7242 = vmatprep.mubr.f32.mxu0 %v8085_v9  ;;  %v8322_v32 = vand.u32 4294901760, %v2558_v29  ;;  %s6694_s29 = sshll.u32 %s8041_s1, 4  ;;  %s6695_s29 = int_to_ptr.vmem [resolvable:$true] %s6694_s29 }
  0x2b   :  { %7251 = vmatpush3.msra.mxu1 %v8073_v4  ;;  %7258 = vmatprep.subr.mxu0 %v8139_v39  ;;  %v8250_v4 = vand.u32 4294901760, %v35_v2  ;;  %v1965_v7 = vsub.f32 %v1963_v3, %v8258_v5  ;;  %v8310_v27 = vand.u32 4294901760, %v2551_v21  ;;  %s8014_s30 = scalar_lea.vmem %s6695_s29, 4096  ;;  %p8019_p6 = scmp.lt.s32.totalorder %s6695_s29, %s6695_s29 }
  0x2c   :  { %7243 = vmatmul.mubr.f32.vlgmr.msra.gmra.mxu0 %v8092_v14  ;;  %7252 = vmatprep.mubr.f32.mxu1 %v8085_v9  ;;  %v2560_v34 = vsub.f32 %v2558_v29, %v8322_v32  ;;  %p8015_p5 = scmp.ne.s32.totalorder %s6695_s29, %s8014_s30  ;;  %p8020_p7 = scmp.lt.s32.totalorder %s8014_s30, %s8014_s30 }
  0x2d   :  { %7259 = vmatpush3.msra.mxu0 %v8139_v39  ;;  %7253 = vmatmul.mubr.f32.vlgmr.msra.gmra.mxu1 %v8092_v14  ;;  %v1970_v6 = vsub.f32 %v35_v2, %v8250_v4  ;;  %v1966_v10 = vand.u32 4294901760, %v1965_v7  ;;  %v2553_v31 = vsub.f32 %v2551_v21, %v8310_v27  ;;  %v43_v2 = vld [vmem:[#allocation2 + $0x70] sm:$0xff] }
  0x2e   :  { %7268 = vmatprep.subr.mxu1 %v790_v49  ;;  %7245 = vmatprep.mubr.f32.mxu0 %v8095_v16  ;;  %v2561_v35 = vand.u32 4294901760, %v2560_v34  ;;  %p8021_p8 = por %p8020_p7, %p8019_p6 }
  0x2f   :  { %7269 = vmatpush3.msra.mxu1 %v790_v49  ;;  %7260 = vmatprep.subr.mxu0 %v8150_v44  ;;  %v8270_v8 = vand.u32 4294901760, %v1970_v6  ;;  %v2554_v33 = vand.u32 4294901760, %v2553_v31 }
  0x30   :  { %7246 = vmatmul.mubr.f32.gmra.mxu0 %v8102_v18  ;;  %7255 = vmatprep.mubr.f32.mxu1 %v8095_v16  ;;  %p8022_p9 = pnand %p8021_p8, %p8015_p5 }
  0x31   :  { %7261 = vmatpush3.msra.mxu0 %v8150_v44  ;;  %7256 = vmatmul.mubr.f32.gmra.mxu1 %v8102_v18  ;;  %v1972_v11 = vsub.f32 %v1970_v6, %v8270_v8 }
  0x32   :  { %7270 = vmatprep.subr.mxu1 %v797_v51  ;;  %7262 = vmatprep.mubr.f32.mxu0 %v8133_v36 }
  0x33   :  { %7271 = vmatpush3.msra.mxu1 %v797_v51  ;;  %7278 = vmatprep.subr.mxu0 %v787_v43  ;;  %v1973_v12 = vand.u32 4294901760, %v1972_v11 }
  0x34   :  { %7263 = vmatmul.mubr.f32.vlgmr.msra.gmra.mxu0 %v8137_v38  ;;  %7272 = vmatprep.mubr.f32.mxu1 %v8085_v9 }
  0x35   :  { %7279 = vmatpush3.msra.mxu0 %v787_v43  ;;  %7273 = vmatmul.mubr.f32.vlgmr.msra.gmra.mxu1 %v8092_v14 }
  0x36   :  { %7288 = vmatprep.subr.mxu1 %v8139_v39  ;;  %7265 = vmatprep.mubr.f32.mxu0 %v8142_v40 }
  0x37   :  { %7289 = vmatpush3.msra.mxu1 %v8139_v39  ;;  %7280 = vmatprep.subr.mxu0 %v794_v46 }
  0x38   :  { %7266 = vmatmul.mubr.f32.gmra.mxu0 %v8145_v42  ;;  %7275 = vmatprep.mubr.f32.mxu1 %v8095_v16 }
  0x39   :  { %7281 = vmatpush3.msra.mxu0 %v794_v46  ;;  %7276 = vmatmul.mubr.f32.gmra.mxu1 %v8102_v18 }
  0x3a   :  { %7290 = vmatprep.subr.mxu1 %v8150_v44  ;;  %7282 = vmatprep.mubr.f32.mxu0 %v8099_v17 }
  0x3b   :  { %7291 = vmatpush3.msra.mxu1 %v8150_v44  ;;  %7298 = vmatprep.subr.mxu0 %v8158_v45 }
  0x3c   :  { %7283 = vmatmul.mubr.f32.vlgmr.msra.gmra.mxu0 %v8106_v20  ;;  %7292 = vmatprep.mubr.f32.mxu1 %v8113_v23 }
  0x3d   :  { %7299 = vmatpush3.msra.mxu0 %v8158_v45  ;;  %7293 = vmatmul.mubr.f32.vlgmr.msra.gmra.mxu1 %v8119_v26 }
  0x3e   :  { %7308 = vmatprep.subr.mxu1 %v8139_v39  ;;  %7285 = vmatprep.mubr.f32.mxu0 %v8109_v22 }
  0x3f   :  { %7309 = vmatpush3.msra.mxu1 %v8139_v39  ;;  %7300 = vmatprep.subr.mxu0 %v8168_v48  ;;  %v8346_v39 = vand.u32 4294901760, %v40_v37 }
  0x40   :  { %7286 = vmatmul.mubr.f32.gmra.mxu0 %v8116_v24  ;;  %7295 = vmatprep.mubr.f32.mxu1 %v8122_v28 }
  0x41   :  { %7301 = vmatpush3.msra.mxu0 %v8168_v48  ;;  %7296 = vmatmul.mubr.f32.gmra.mxu1 %v8127_v30  ;;  %v3139_v43 = vsub.f32 %v40_v37, %v8346_v39 }
  0x42   :  { %7310 = vmatprep.subr.mxu1 %v8150_v44  ;;  %7302 = vmatprep.mubr.f32.mxu0 %v8085_v9 }
  0x43   :  { %7311 = vmatpush3.msra.mxu1 %v8150_v44  ;;  %7318 = vmatprep.subr.mxu0 %v8190_v53  ;;  %v8354_v44 = vand.u32 4294901760, %v39_v41  ;;  %v8362_v45 = vand.u32 4294901760, %v3139_v43 }
  0x44   :  { %7303 = vmatmul.mubr.f32.vlgmr.msra.gmra.mxu0 %v8092_v14  ;;  %7312 = vmatprep.mubr.f32.mxu1 %v8085_v9 }
  0x45   :  { %7319 = vmatpush3.msra.mxu0 %v8190_v53  ;;  %7313 = vmatmul.mubr.f32.vlgmr.msra.gmra.mxu1 %v8092_v14  ;;  %v3146_v46 = vsub.f32 %v39_v41, %v8354_v44  ;;  %v3141_v47 = vsub.f32 %v3139_v43, %v8362_v45 }
  0x46   :  { %7328 = vmatprep.subr.mxu1 %v1378_v61  ;;  %7305 = vmatprep.mubr.f32.mxu0 %v8095_v16 }
  0x47   :  { %7329 = vmatpush3.msra.mxu1 %v1378_v61  ;;  %7320 = vmatprep.subr.mxu0 %v8198_v56  ;;  %v8374_v48 = vand.u32 4294901760, %v3146_v46  ;;  %v3142_v49 = vand.u32 4294901760, %v3141_v47 }
  0x48   :  { %7306 = vmatmul.mubr.f32.gmra.mxu0 %v8102_v18  ;;  %7315 = vmatprep.mubr.f32.mxu1 %v8095_v16 }
  0x49   :  { %7321 = vmatpush3.msra.mxu0 %v8198_v56  ;;  %7316 = vmatmul.mubr.f32.gmra.mxu1 %v8102_v18  ;;  %v3148_v50 = vsub.f32 %v3146_v46, %v8374_v48 }
  0x4a   :  { %7330 = vmatprep.subr.mxu1 %v1385_v63  ;;  %7322 = vmatprep.mubr.f32.mxu0 %v8133_v36 }
  0x4b   :  { %7331 = vmatpush3.msra.mxu1 %v1385_v63  ;;  %7338 = vmatprep.subr.mxu0 %v1375_v55  ;;  %v3149_v51 = vand.u32 4294901760, %v3148_v50 }
  0x4c   :  { %7323 = vmatmul.mubr.f32.vlgmr.msra.gmra.mxu0 %v8137_v38  ;;  %7332 = vmatprep.mubr.f32.mxu1 %v8085_v9 }
  0x4d   :  { %7339 = vmatpush3.msra.mxu0 %v1375_v55  ;;  %7333 = vmatmul.mubr.f32.vlgmr.msra.gmra.mxu1 %v8092_v14 }
  0x4e   :  { %7348 = vmatprep.subr.mxu1 %v8190_v53  ;;  %7325 = vmatprep.mubr.f32.mxu0 %v8142_v40 }
  0x4f   :  { %7349 = vmatpush3.msra.mxu1 %v8190_v53  ;;  %7340 = vmatprep.subr.mxu0 %v1382_v58 }
  0x50   :  { %7326 = vmatmul.mubr.f32.gmra.mxu0 %v8145_v42  ;;  %7335 = vmatprep.mubr.f32.mxu1 %v8095_v16 }
  0x51   :  { %7341 = vmatpush3.msra.mxu0 %v1382_v58  ;;  %7336 = vmatmul.mubr.f32.gmra.mxu1 %v8102_v18 }
  0x52   :  { %7350 = vmatprep.subr.mxu1 %v8198_v56  ;;  %7342 = vmatprep.mubr.f32.mxu0 %v8099_v17 }
  0x53   :  { %7351 = vmatpush3.msra.mxu1 %v8198_v56  ;;  %7358 = vmatprep.subr.mxu0 %v8206_v57 }
  0x54   :  { %7343 = vmatmul.mubr.f32.vlgmr.msra.gmra.mxu0 %v8106_v20  ;;  %7352 = vmatprep.mubr.f32.mxu1 %v8113_v23 }
  0x55   :  { %7359 = vmatpush3.msra.mxu0 %v8206_v57  ;;  %7353 = vmatmul.mubr.f32.vlgmr.msra.gmra.mxu1 %v8119_v26 }
  0x56   :  { %7368 = vmatprep.subr.mxu1 %v8190_v53  ;;  %7345 = vmatprep.mubr.f32.mxu0 %v8109_v22 }
  0x57   :  { %7369 = vmatpush3.msra.mxu1 %v8190_v53  ;;  %7360 = vmatprep.subr.mxu0 %v8218_v60  ;;  %v8398_v53 = vand.u32 4294901760, %v42_v52 }
  0x58   :  { %7346 = vmatmul.mubr.f32.gmra.mxu0 %v8116_v24  ;;  %7355 = vmatprep.mubr.f32.mxu1 %v8122_v28 }
  0x59   :  { %7361 = vmatpush3.msra.mxu0 %v8218_v60  ;;  %7356 = vmatmul.mubr.f32.gmra.mxu1 %v8127_v30  ;;  %v3727_v55 = vsub.f32 %v42_v52, %v8398_v53 }
  0x5a   :  { %7370 = vmatprep.subr.mxu1 %v8198_v56  ;;  %7362 = vmatprep.mubr.f32.mxu0 %v8085_v9 }
  0x5b   :  { %7371 = vmatpush3.msra.mxu1 %v8198_v56  ;;  %7378 = vmatprep.subr.mxu0 %v8242_v1  ;;  %v8406_v56 = vand.u32 4294901760, %v41_v54  ;;  %v8414_v57 = vand.u32 4294901760, %v3727_v55 }
  0x5c   :  { %7363 = vmatmul.mubr.f32.vlgmr.msra.gmra.mxu0 %v8092_v14  ;;  %7372 = vmatprep.mubr.f32.mxu1 %v8085_v9 }
  0x5d   :  { %7379 = vmatpush3.msra.mxu0 %v8242_v1  ;;  %7373 = vmatmul.mubr.f32.vlgmr.msra.gmra.mxu1 %v8092_v14  ;;  %v3734_v58 = vsub.f32 %v41_v54, %v8406_v56  ;;  %v3729_v59 = vsub.f32 %v3727_v55, %v8414_v57 }
  0x5e   :  { %7388 = vmatprep.subr.mxu1 %v1966_v10  ;;  %7365 = vmatprep.mubr.f32.mxu0 %v8095_v16 }
  0x5f   :  { %7389 = vmatpush3.msra.mxu1 %v1966_v10  ;;  %7380 = vmatprep.subr.mxu0 %v8250_v4  ;;  %v8426_v60 = vand.u32 4294901760, %v3734_v58  ;;  %v3730_v61 = vand.u32 4294901760, %v3729_v59 }
  0x60   :  { %7366 = vmatmul.mubr.f32.gmra.mxu0 %v8102_v18  ;;  %7375 = vmatprep.mubr.f32.mxu1 %v8095_v16 }
  0x61   :  { %7381 = vmatpush3.msra.mxu0 %v8250_v4  ;;  %7376 = vmatmul.mubr.f32.gmra.mxu1 %v8102_v18  ;;  %v3736_v62 = vsub.f32 %v3734_v58, %v8426_v60 }
  0x62   :  { %7390 = vmatprep.subr.mxu1 %v1973_v12  ;;  %7382 = vmatprep.mubr.f32.mxu0 %v8133_v36 }
  0x63   :  { %7391 = vmatpush3.msra.mxu1 %v1973_v12  ;;  %7398 = vmatprep.subr.mxu0 %v1963_v3  ;;  %v3737_v63 = vand.u32 4294901760, %v3736_v62 }
  0x64   :  { %7383 = vmatmul.mubr.f32.vlgmr.msra.gmra.mxu0 %v8137_v38  ;;  %7392 = vmatprep.mubr.f32.mxu1 %v8085_v9 }
  0x65   :  { %7399 = vmatpush3.msra.mxu0 %v1963_v3  ;;  %7393 = vmatmul.mubr.f32.vlgmr.msra.gmra.mxu1 %v8092_v14 }
  0x66   :  { %7408 = vmatprep.subr.mxu1 %v8242_v1  ;;  %7385 = vmatprep.mubr.f32.mxu0 %v8142_v40 }
  0x67   :  { %7409 = vmatpush3.msra.mxu1 %v8242_v1  ;;  %7400 = vmatprep.subr.mxu0 %v1970_v6 }
  0x68   :  { %7386 = vmatmul.mubr.f32.gmra.mxu0 %v8145_v42  ;;  %7395 = vmatprep.mubr.f32.mxu1 %v8095_v16 }
  0x69   :  { %7401 = vmatpush3.msra.mxu0 %v1970_v6  ;;  %7396 = vmatmul.mubr.f32.gmra.mxu1 %v8102_v18 }
  0x6a   :  { %7410 = vmatprep.subr.mxu1 %v8250_v4  ;;  %7402 = vmatprep.mubr.f32.mxu0 %v8099_v17 }
  0x6b   :  { %7411 = vmatpush3.msra.mxu1 %v8250_v4  ;;  %7418 = vmatprep.subr.mxu0 %v8258_v5 }
  0x6c   :  { %7403 = vmatmul.mubr.f32.vlgmr.msra.gmra.mxu0 %v8106_v20  ;;  %7412 = vmatprep.mubr.f32.mxu1 %v8113_v23 }
  0x6d   :  { %7419 = vmatpush3.msra.mxu0 %v8258_v5  ;;  %7413 = vmatmul.mubr.f32.vlgmr.msra.gmra.mxu1 %v8119_v26 }
  0x6e   :  { %7428 = vmatprep.subr.mxu1 %v8242_v1  ;;  %7405 = vmatprep.mubr.f32.mxu0 %v8109_v22 }
  0x6f   :  { %7429 = vmatpush3.msra.mxu1 %v8242_v1  ;;  %7420 = vmatprep.subr.mxu0 %v8270_v8  ;;  %v8450_v1 = vand.u32 4294901760, %v44_v0 }
  0x70   :  { %7406 = vmatmul.mubr.f32.gmra.mxu0 %v8116_v24  ;;  %7415 = vmatprep.mubr.f32.mxu1 %v8122_v28 }
  0x71   :  { %7421 = vmatpush3.msra.mxu0 %v8270_v8  ;;  %7416 = vmatmul.mubr.f32.gmra.mxu1 %v8127_v30  ;;  %v4315_v3 = vsub.f32 %v44_v0, %v8450_v1 }
  0x72   :  { %7430 = vmatprep.subr.mxu1 %v8250_v4  ;;  %7422 = vmatprep.mubr.f32.mxu0 %v8085_v9 }
  0x73   :  { %7431 = vmatpush3.msra.mxu1 %v8250_v4  ;;  %7438 = vmatprep.subr.mxu0 %v8294_v15  ;;  %v8458_v4 = vand.u32 4294901760, %v43_v2  ;;  %v8466_v5 = vand.u32 4294901760, %v4315_v3 }
  0x74   :  { %7423 = vmatmul.mubr.f32.vlgmr.msra.gmra.mxu0 %v8092_v14  ;;  %7432 = vmatprep.mubr.f32.mxu1 %v8085_v9 }
  0x75   :  { %7439 = vmatpush3.msra.mxu0 %v8294_v15  ;;  %7433 = vmatmul.mubr.f32.vlgmr.msra.gmra.mxu1 %v8092_v14  ;;  %v4322_v6 = vsub.f32 %v43_v2, %v8458_v4  ;;  %v4317_v7 = vsub.f32 %v4315_v3, %v8466_v5 }
  0x76   :  { %7448 = vmatprep.subr.mxu1 %v2554_v33  ;;  %7425 = vmatprep.mubr.f32.mxu0 %v8095_v16 }
  0x77   :  { %7449 = vmatpush3.msra.mxu1 %v2554_v33  ;;  %7440 = vmatprep.subr.mxu0 %v8302_v25  ;;  %v8478_v8 = vand.u32 4294901760, %v4322_v6  ;;  %v4318_v10 = vand.u32 4294901760, %v4317_v7 }
  0x78   :  { %7426 = vmatmul.mubr.f32.gmra.mxu0 %v8102_v18  ;;  %7435 = vmatprep.mubr.f32.mxu1 %v8095_v16 }
  0x79   :  { %7441 = vmatpush3.msra.mxu0 %v8302_v25  ;;  %7436 = vmatmul.mubr.f32.gmra.mxu1 %v8102_v18  ;;  %v4324_v11 = vsub.f32 %v4322_v6, %v8478_v8 }
  0x7a   :  { %7450 = vmatprep.subr.mxu1 %v2561_v35  ;;  %7442 = vmatprep.mubr.f32.mxu0 %v8133_v36 }
  0x7b   :  { %7451 = vmatpush3.msra.mxu1 %v2561_v35  ;;  %7458 = vmatprep.subr.mxu0 %v2551_v21  ;;  %v4325_v12 = vand.u32 4294901760, %v4324_v11 }
  0x7c   :  { %7443 = vmatmul.mubr.f32.vlgmr.msra.gmra.mxu0 %v8137_v38  ;;  %7452 = vmatprep.mubr.f32.mxu1 %v8085_v9 }
  0x7d   :  { %7459 = vmatpush3.msra.mxu0 %v2551_v21  ;;  %7453 = vmatmul.mubr.f32.vlgmr.msra.gmra.mxu1 %v8092_v14  ;;  %v8512_v21 = vand.u32 4294901760, %v4766_v19 }
  0x7e   :  { %7468 = vmatprep.subr.mxu1 %v8294_v15  ;;  %7445 = vmatprep.mubr.f32.mxu0 %v8142_v40 }
  0x7f   :  { %7469 = vmatpush3.msra.mxu1 %v8294_v15  ;;  %7460 = vmatprep.subr.mxu0 %v2558_v29 }
  0x80   :  { %7446 = vmatmul.mubr.f32.gmra.mxu0 %v8145_v42  ;;  %7455 = vmatprep.mubr.f32.mxu1 %v8095_v16 }
  0x81   :  { %7461 = vmatpush3.msra.mxu0 %v2558_v29  ;;  %7456 = vmatmul.mubr.f32.gmra.mxu1 %v8102_v18 }
  0x82   :  { %7470 = vmatprep.subr.mxu1 %v8302_v25  ;;  %7462 = vmatprep.mubr.f32.mxu0 %v8099_v17 }
  0x83   :  { %7471 = vmatpush3.msra.mxu1 %v8302_v25  ;;  %7478 = vmatprep.subr.mxu0 %v8310_v27 }
  0x84   :  { %7463 = vmatmul.mubr.f32.vlgmr.msra.gmra.mxu0 %v8106_v20  ;;  %7472 = vmatprep.mubr.f32.mxu1 %v8113_v23 }
  0x85   :  { %7479 = vmatpush3.msra.mxu0 %v8310_v27  ;;  %7473 = vmatmul.mubr.f32.vlgmr.msra.gmra.mxu1 %v8119_v26 }
  0x86   :  { %7488 = vmatprep.subr.mxu1 %v8294_v15  ;;  %7465 = vmatprep.mubr.f32.mxu0 %v8109_v22 }
  0x87   :  { %7489 = vmatpush3.msra.mxu1 %v8294_v15  ;;  %7480 = vmatprep.subr.mxu0 %v8322_v32  ;;  %v8504_v15 = vand.u32 4294901760, %v4767_v13 }
  0x88   :  { %7466 = vmatmul.mubr.f32.gmra.mxu0 %v8116_v24  ;;  %7475 = vmatprep.mubr.f32.mxu1 %v8122_v28 }
  0x89   :  { %7481 = vmatpush3.msra.mxu0 %v8322_v32  ;;  %7476 = vmatmul.mubr.f32.gmra.mxu1 %v8127_v30 }
  0x8a   :  { %7490 = vmatprep.subr.mxu1 %v8302_v25  ;;  %7482 = vmatprep.mubr.f32.mxu0 %v8085_v9 }
  0x8b   :  { %7491 = vmatpush3.msra.mxu1 %v8302_v25  ;;  %7498 = vmatprep.subr.mxu0 %v8346_v39  ;;  %v8516_v25 = vsub.f32 %v4767_v13, %v8504_v15 }
  0x8c   :  { %7483 = vmatmul.mubr.f32.vlgmr.msra.gmra.mxu0 %v8092_v14  ;;  %7492 = vmatprep.mubr.f32.mxu1 %v8085_v9 }
  0x8d   :  { %7499 = vmatpush3.msra.mxu0 %v8346_v39  ;;  %7493 = vmatmul.mubr.f32.vlgmr.msra.gmra.mxu1 %v8092_v14 }
  0x8e   :  { %7508 = vmatprep.subr.mxu1 %v3142_v49  ;;  %7485 = vmatprep.mubr.f32.mxu0 %v8095_v16 }
  0x8f   :  { %7509 = vmatpush3.msra.mxu1 %v3142_v49  ;;  %7500 = vmatprep.subr.mxu0 %v8354_v44 }
  0x90   :  { %7486 = vmatmul.mubr.f32.gmra.mxu0 %v8102_v18  ;;  %7495 = vmatprep.mubr.f32.mxu1 %v8095_v16 }
  0x91   :  { %7501 = vmatpush3.msra.mxu0 %v8354_v44  ;;  %7496 = vmatmul.mubr.f32.gmra.mxu1 %v8102_v18 }
  0x92   :  { %7510 = vmatprep.subr.mxu1 %v3149_v51  ;;  %7502 = vmatprep.mubr.f32.mxu0 %v8133_v36 }
  0x93   :  { %7511 = vmatpush3.msra.mxu1 %v3149_v51  ;;  %7518 = vmatprep.subr.mxu0 %v3139_v43 }
  0x94   :  { %7503 = vmatmul.mubr.f32.vlgmr.msra.gmra.mxu0 %v8137_v38  ;;  %7512 = vmatprep.mubr.f32.mxu1 %v8085_v9 }
  0x95   :  { %7519 = vmatpush3.msra.mxu0 %v3139_v43  ;;  %7513 = vmatmul.mubr.f32.vlgmr.msra.gmra.mxu1 %v8092_v14 }
  0x96   :  { %7528 = vmatprep.subr.mxu1 %v8346_v39  ;;  %7505 = vmatprep.mubr.f32.mxu0 %v8142_v40 }
  0x97   :  { %7529 = vmatpush3.msra.mxu1 %v8346_v39  ;;  %7520 = vmatprep.subr.mxu0 %v3146_v46 }
  0x98   :  { %7506 = vmatmul.mubr.f32.gmra.mxu0 %v8145_v42  ;;  %7515 = vmatprep.mubr.f32.mxu1 %v8095_v16 }
  0x99   :  { %7521 = vmatpush3.msra.mxu0 %v3146_v46  ;;  %7516 = vmatmul.mubr.f32.gmra.mxu1 %v8102_v18 }
  0x9a   :  { %7530 = vmatprep.subr.mxu1 %v8354_v44  ;;  %7522 = vmatprep.mubr.f32.mxu0 %v8099_v17 }
  0x9b   :  { %7531 = vmatpush3.msra.mxu1 %v8354_v44  ;;  %7538 = vmatprep.subr.mxu0 %v8362_v45 }
  0x9c   :  { %7523 = vmatmul.mubr.f32.vlgmr.msra.gmra.mxu0 %v8106_v20  ;;  %7532 = vmatprep.mubr.f32.mxu1 %v8113_v23 }
  0x9d   :  { %7539 = vmatpush3.msra.mxu0 %v8362_v45  ;;  %7533 = vmatmul.mubr.f32.vlgmr.msra.gmra.mxu1 %v8119_v26 }
  0x9e   :  { %7548 = vmatprep.subr.mxu1 %v8346_v39  ;;  %7525 = vmatprep.mubr.f32.mxu0 %v8109_v22 }
  0x9f   :  { %7549 = vmatpush3.msra.mxu1 %v8346_v39  ;;  %7540 = vmatprep.subr.mxu0 %v8374_v48 }
  0xa0   :  { %7526 = vmatmul.mubr.f32.gmra.mxu0 %v8116_v24  ;;  %7535 = vmatprep.mubr.f32.mxu1 %v8122_v28 }
  0xa1   :  { %7541 = vmatpush3.msra.mxu0 %v8374_v48  ;;  %7536 = vmatmul.mubr.f32.gmra.mxu1 %v8127_v30 }
  0xa2   :  { %7550 = vmatprep.subr.mxu1 %v8354_v44  ;;  %7542 = vmatprep.mubr.f32.mxu0 %v8085_v9 }
  0xa3   :  { %7551 = vmatpush3.msra.mxu1 %v8354_v44  ;;  %7558 = vmatprep.subr.mxu0 %v8398_v53 }
  0xa4   :  { %7543 = vmatmul.mubr.f32.vlgmr.msra.gmra.mxu0 %v8092_v14  ;;  %7552 = vmatprep.mubr.f32.mxu1 %v8085_v9 }
  0xa5   :  { %7559 = vmatpush3.msra.mxu0 %v8398_v53  ;;  %7553 = vmatmul.mubr.f32.vlgmr.msra.gmra.mxu1 %v8092_v14 }
  0xa6   :  { %7568 = vmatprep.subr.mxu1 %v3730_v61  ;;  %7545 = vmatprep.mubr.f32.mxu0 %v8095_v16 }
  0xa7   :  { %7569 = vmatpush3.msra.mxu1 %v3730_v61  ;;  %7560 = vmatprep.subr.mxu0 %v8406_v56 }
  0xa8   :  { %7546 = vmatmul.mubr.f32.gmra.mxu0 %v8102_v18  ;;  %7555 = vmatprep.mubr.f32.mxu1 %v8095_v16 }
  0xa9   :  { %7561 = vmatpush3.msra.mxu0 %v8406_v56  ;;  %7556 = vmatmul.mubr.f32.gmra.mxu1 %v8102_v18 }
  0xaa   :  { %7570 = vmatprep.subr.mxu1 %v3737_v63  ;;  %7562 = vmatprep.mubr.f32.mxu0 %v8133_v36 }
  0xab   :  { %7571 = vmatpush3.msra.mxu1 %v3737_v63  ;;  %7578 = vmatprep.subr.mxu0 %v3727_v55 }
  0xac   :  { %7563 = vmatmul.mubr.f32.vlgmr.msra.gmra.mxu0 %v8137_v38  ;;  %7572 = vmatprep.mubr.f32.mxu1 %v8085_v9 }
  0xad   :  { %7579 = vmatpush3.msra.mxu0 %v3727_v55  ;;  %7573 = vmatmul.mubr.f32.vlgmr.msra.gmra.mxu1 %v8092_v14 }
  0xae   :  { %7588 = vmatprep.subr.mxu1 %v8398_v53  ;;  %7565 = vmatprep.mubr.f32.mxu0 %v8142_v40 }
  0xaf   :  { %7589 = vmatpush3.msra.mxu1 %v8398_v53  ;;  %7580 = vmatprep.subr.mxu0 %v3734_v58 }
  0xb0   :  { %7566 = vmatmul.mubr.f32.gmra.mxu0 %v8145_v42  ;;  %7575 = vmatprep.mubr.f32.mxu1 %v8095_v16 }
  0xb1   :  { %7581 = vmatpush3.msra.mxu0 %v3734_v58  ;;  %7576 = vmatmul.mubr.f32.gmra.mxu1 %v8102_v18 }
  0xb2   :  { %7590 = vmatprep.subr.mxu1 %v8406_v56  ;;  %7582 = vmatprep.mubr.f32.mxu0 %v8099_v17 }
  0xb3   :  { %7591 = vmatpush3.msra.mxu1 %v8406_v56  ;;  %7598 = vmatprep.subr.mxu0 %v8414_v57 }
  0xb4   :  { %7583 = vmatmul.mubr.f32.vlgmr.msra.gmra.mxu0 %v8106_v20  ;;  %7592 = vmatprep.mubr.f32.mxu1 %v8113_v23 }
  0xb5   :  { %7599 = vmatpush3.msra.mxu0 %v8414_v57  ;;  %7593 = vmatmul.mubr.f32.vlgmr.msra.gmra.mxu1 %v8119_v26 }
  0xb6   :  { %7608 = vmatprep.subr.mxu1 %v8398_v53  ;;  %7585 = vmatprep.mubr.f32.mxu0 %v8109_v22 }
  0xb7   :  { %7609 = vmatpush3.msra.mxu1 %v8398_v53  ;;  %7600 = vmatprep.subr.mxu0 %v8426_v60 }
  0xb8   :  { %7586 = vmatmul.mubr.f32.gmra.mxu0 %v8116_v24  ;;  %7595 = vmatprep.mubr.f32.mxu1 %v8122_v28 }
  0xb9   :  { %7601 = vmatpush3.msra.mxu0 %v8426_v60  ;;  %7596 = vmatmul.mubr.f32.gmra.mxu1 %v8127_v30 }
  0xba   :  { %7610 = vmatprep.subr.mxu1 %v8406_v56  ;;  %7602 = vmatprep.mubr.f32.mxu0 %v8085_v9 }
  0xbb   :  { %7611 = vmatpush3.msra.mxu1 %v8406_v56  ;;  %7618 = vmatprep.subr.mxu0 %v8450_v1 }
  0xbc   :  { %7603 = vmatmul.mubr.f32.vlgmr.msra.gmra.mxu0 %v8092_v14  ;;  %7612 = vmatprep.mubr.f32.mxu1 %v8085_v9 }
  0xbd   :  { %7619 = vmatpush3.msra.mxu0 %v8450_v1  ;;  %7613 = vmatmul.mubr.f32.vlgmr.msra.gmra.mxu1 %v8092_v14 }
  0xbe   :  { %7628 = vmatprep.subr.mxu1 %v4318_v10  ;;  %7605 = vmatprep.mubr.f32.mxu0 %v8095_v16 }
  0xbf   :  { %7629 = vmatpush3.msra.mxu1 %v4318_v10  ;;  %7620 = vmatprep.subr.mxu0 %v8458_v4 }
  0xc0   :  { %7606 = vmatmul.mubr.f32.gmra.mxu0 %v8102_v18  ;;  %7615 = vmatprep.mubr.f32.mxu1 %v8095_v16 }
  0xc1   :  { %7621 = vmatpush3.msra.mxu0 %v8458_v4  ;;  %7616 = vmatmul.mubr.f32.gmra.mxu1 %v8102_v18 }
  0xc2   :  { %7630 = vmatprep.subr.mxu1 %v4325_v12  ;;  %7622 = vmatprep.mubr.f32.mxu0 %v8133_v36  ;;  %v8524_v36 = vsub.f32 %v4766_v19, %v8512_v21 }
  0xc3   :  { %7631 = vmatpush3.msra.mxu1 %v4325_v12  ;;  %7638 = vmatprep.subr.mxu0 %v4315_v3 }
  0xc4   :  { %7623 = vmatmul.mubr.f32.vlgmr.msra.gmra.mxu0 %v8137_v38  ;;  %7632 = vmatprep.mubr.f32.mxu1 %v8085_v9  ;;  %v8528_v38 = vand.u32 4294901760, %v8516_v25 }
  0xc5   :  { %7639 = vmatpush3.msra.mxu0 %v4315_v3  ;;  %7633 = vmatmul.mubr.f32.vlgmr.msra.gmra.mxu1 %v8092_v14 }
  0xc6   :  { %7648 = vmatprep.subr.mxu1 %v8450_v1  ;;  %7625 = vmatprep.mubr.f32.mxu0 %v8142_v40  ;;  %v8537_v40 = vand.u32 4294901760, %v8524_v36 }
  0xc7   :  { %7649 = vmatpush3.msra.mxu1 %v8450_v1  ;;  %7640 = vmatprep.subr.mxu0 %v4322_v6 }
  0xc8   :  { %7626 = vmatmul.mubr.f32.gmra.mxu0 %v8145_v42  ;;  %7635 = vmatprep.mubr.f32.mxu1 %v8095_v16  ;;  %v5283_v42 = vsub.f32 %v8516_v25, %v8528_v38 }
  0xc9   :  { %7641 = vmatpush3.msra.mxu0 %v4322_v6  ;;  %7636 = vmatmul.mubr.f32.gmra.mxu1 %v8102_v18 }
  0xca   :  { %7650 = vmatprep.subr.mxu1 %v8458_v4  ;;  %7642 = vmatprep.mubr.f32.mxu0 %v8099_v17  ;;  %v5290_v17 = vsub.f32 %v8524_v36, %v8537_v40 }
  0xcb   :  { %7651 = vmatpush3.msra.mxu1 %v8458_v4  ;;  %7658 = vmatprep.subr.mxu0 %v8466_v5 }
  0xcc   :  { %7643 = vmatmul.mubr.f32.vlgmr.msra.gmra.mxu0 %v8106_v20  ;;  %7652 = vmatprep.mubr.f32.mxu1 %v8113_v23  ;;  %v5284_v20 = vand.u32 4294901760, %v5283_v42 }
  0xcd   :  { %7659 = vmatpush3.msra.mxu0 %v8466_v5  ;;  %7653 = vmatmul.mubr.f32.vlgmr.msra.gmra.mxu1 %v8119_v26 }
  0xce   :  { %7668 = vmatprep.subr.mxu1 %v8450_v1  ;;  %7645 = vmatprep.mubr.f32.mxu0 %v8109_v22  ;;  %v5291_v22 = vand.u32 4294901760, %v5290_v17 }
  0xcf   :  { %7669 = vmatpush3.msra.mxu1 %v8450_v1  ;;  %7660 = vmatprep.subr.mxu0 %v8478_v8 }
  0xd0   :  { %7646 = vmatmul.mubr.f32.gmra.mxu0 %v8116_v24  ;;  %7655 = vmatprep.mubr.f32.mxu1 %v8122_v28 }
  0xd1   :  { %7661 = vmatpush3.msra.mxu0 %v8478_v8  ;;  %7656 = vmatmul.mubr.f32.gmra.mxu1 %v8127_v30 }
  0xd2   :  { %7670 = vmatprep.subr.mxu1 %v8458_v4  ;;  %7662 = vmatprep.mubr.f32.mxu0 %v8085_v9 }
  0xd3   :  { %7671 = vmatpush3.msra.mxu1 %v8458_v4  ;;  %7672 = vmatprep.mubr.f32.mxu1 %v8085_v9 }
  0xd4   :  { %7663 = vmatmul.mubr.f32.vlgmr.msra.gmra.mxu0 %v8092_v14  ;;  %7730 = vmatprep.subr.mxu1 %v5284_v20 }
  0xd5   :  { %7665 = vmatprep.mubr.f32.mxu0 %v8095_v16  ;;  %7673 = vmatmul.mubr.f32.vlgmr.msra.gmra.mxu1 %v8092_v14 }
  0xd6   :  { %7678 = vmatprep.subr.mxu0 %v8504_v15  ;;  %7675 = vmatprep.mubr.f32.mxu1 %v8095_v16 }
  0xd7   :  { %7731 = vmatpush3.msra.mxu1 %v5284_v20  ;;  %7679 = vmatpush3.msra.mxu0 %v8504_v15 }
  0xd8   :  { %7666 = vmatmul.mubr.f32.gmra.mxu0 %v8102_v18  ;;  %7732 = vmatprep.subr.mxu1 %v5291_v22 }
  0xd9   :  { %7733 = vmatpush3.msra.mxu1 %v5291_v22  ;;  %7680 = vmatprep.subr.mxu0 %v8512_v21 }
  0xda   :  { %7676 = vmatmul.mubr.f32.gmra.mxu1 %v8102_v18  ;;  %7681 = vmatpush3.msra.mxu0 %v8512_v21 }
  0xdb   :  { %7834 = vmatprep.subr.mxu1 %v8504_v15  ;;  %7782 = vmatprep.subr.mxu0 %v8516_v25 }
  0xdc   :  { %v7204_v9 = vpop.f32.mrf.mxu0 }
  0xdd   :  { %v7214_v16 = vpop.f32.mrf.mxu1 }
  0xde   :  { %v135_v14 = vpop.f32.mrf.mxu0  ;;  %v253_v29 = vadd.f32 %v7214_v16, %v7204_v9 }
  0xdf   :  { %v246_v24 = vpop.f32.mrf.mxu1 }
  0xe0   :  { %v7207_v23 = vpop.f32.mrf.mxu0  ;;  %v247_v32 = vadd.f32 %v246_v24, %v135_v14 }
  0xe1   :  { %v7217_v28 = vpop.f32.mrf.mxu1 }
  0xe2   :  { %v155_v26 = vpop.f32.mrf.mxu0  ;;  %v265_v37 = vadd.f32 %v7217_v28, %v7207_v23 }
  0xe3   :  { %v258_v30 = vpop.f32.mrf.mxu1 }
  0xe4   :  { %v7224_v27 = vpop.f32.mrf.mxu0  ;;  %v259_v44 = vadd.f32 %v258_v30, %v155_v26 }
  0xe5   :  { %v7234_v18 = vpop.f32.mrf.mxu1  ;;  %v348_v33 = vadd.f32 %v7224_v27, %v253_v29 }
  0xe6   :  { %v340_v31 = vpop.f32.mrf.mxu0 }
  0xe7   :  { %v436_v35 = vpop.f32.mrf.mxu1  ;;  %v341_v39 = vadd.f32 %v340_v31, %v247_v32  ;;  %v445_v45 = vadd.f32 %v7234_v18, %v348_v33 }
  0xe8   :  { %v7227_v34 = vpop.f32.mrf.mxu0 }
  0xe9   :  { %v7237_v43 = vpop.f32.mrf.mxu1  ;;  %v362_v46 = vadd.f32 %v7227_v34, %v265_v37  ;;  %v437_v49 = vadd.f32 %v436_v35, %v341_v39 }
  0xea   :  { %v354_v41 = vpop.f32.mrf.mxu0 }
  0xeb   :  { %v452_v47 = vpop.f32.mrf.mxu1  ;;  %v355_v50 = vadd.f32 %v354_v41, %v259_v44  ;;  %v461_v54 = vadd.f32 %v7237_v43, %v362_v46 }
  0xec   :  { %v7244_v48 = vpop.f32.mrf.mxu0 }
  0xed   :  { %v544_v51 = vadd.f32 %v7244_v48, %v445_v45  ;;  %v7254_v53 = vpop.f32.mrf.mxu1  ;;  %v453_v59 = vadd.f32 %v452_v47, %v355_v50 }
  0xee   :  { %v537_v52 = vpop.f32.mrf.mxu0 }
  0xef   :  { %v538_v55 = vadd.f32 %v537_v52, %v437_v49  ;;  %v635_v56 = vadd.f32 %v7254_v53, %v544_v51  ;;  %v628_v58 = vpop.f32.mrf.mxu1 }
  0xf0   :  { %v7247_v57 = vpop.f32.mrf.mxu0 }
  0xf1   :  { %v4772_v60 = vsel %vm49_vm0, %v635_v56, 0  ;;  %v556_v61 = vadd.f32 %v7247_v57, %v461_v54  ;;  %v629_v62 = vadd.f32 %v628_v58, %v538_v55  ;;  %v7257_v1 = vpop.f32.mrf.mxu1 }
  0xf2   :  { %v8571_v63 = vand.u32 4294901760, %v4772_v60  ;;  %v549_v0 = vpop.f32.mrf.mxu0 }
  0xf3   :  { %v4769_v2 = vsel %vm49_vm0, %v629_v62, 0  ;;  %v550_v3 = vadd.f32 %v549_v0, %v453_v59  ;;  %v647_v4 = vadd.f32 %v7257_v1, %v556_v61  ;;  %v640_v7 = vpop.f32.mrf.mxu1 }
  0xf4   :  { %v8575_v5 = vsub.f32 %v4772_v60, %v8571_v63  ;;  %v8577_v6 = vand.u32 4294901760, %v4769_v2  ;;  %v7264_v8 = vpop.f32.mrf.mxu0 }
  0xf5   :  { %v4778_v10 = vsel %vm49_vm0, %v647_v4, 0  ;;  %v641_v11 = vadd.f32 %v640_v7, %v550_v3  ;;  %v7274_v17 = vpop.f32.mrf.mxu1 }
  0xf6   :  { %v9430_v12 = vand.u32 4294901760, %v8575_v5  ;;  %v8582_v13 = vsub.f32 %v4769_v2, %v8577_v6  ;;  %v8584_v19 = vand.u32 4294901760, %v4778_v10  ;;  %v723_v42 = vpop.f32.mrf.mxu0  ;;  %7734 = vmatprep.mubr.f32.mxu1 %v8577_v6  ;;  %v841_v35 = vadd.f32 %v7274_v17, %v7264_v8 }
  0xf7   :  { %v4775_v20 = vsel %vm49_vm0, %v641_v11, 0  ;;  %7735 = vmatmul.mubr.f32.vlgmr.msra.gmra.mxu1 %v8571_v63  ;;  %v834_v16 = vpop.f32.mrf.mxu1 }
  0xf8   :  { %9497 = vst [vmem:[#allocation8_spill] sm:$0xff] %v8584_v19  ;;  %v8590_v22 = vsub.f32 %v4778_v10, %v8584_v19  ;;  %v8592_v9 = vand.u32 4294901760, %v4775_v20  ;;  %v7267_v14 = vpop.f32.mrf.mxu0  ;;  %v9431_v23 = vand.u32 4294901760, %v8582_v13  ;;  %7835 = vmatpush3.msra.mxu1 %v8504_v15  ;;  %v4944_v24 = vsub.f32 %v8575_v5, %v9430_v12 }
  0xf9   :  { %7836 = vmatprep.subr.mxu1 %v8512_v21  ;;  %v7277_v30 = vpop.f32.mrf.mxu1  ;;  %v835_v44 = vadd.f32 %v834_v16, %v723_v42 }
  0xfa   :  { %9498 = vst [vmem:[#allocation9_spill] sm:$0xff] %v8592_v9  ;;  %v8601_v26 = vsub.f32 %v4775_v20, %v8592_v9  ;;  %v743_v28 = vpop.f32.mrf.mxu0  ;;  %7737 = vmatprep.mubr.f32.mxu1 %v8592_v9  ;;  %v4934_v27 = vsub.f32 %v8582_v13, %v9431_v23  ;;  %v9427_v29 = vand.u32 4294901760, %v8590_v22  ;;  %7837 = vmatpush3.msra.mxu1 %v8512_v21  ;;  %v4945_v34 = vand.u32 4294901760, %v4944_v24 }
  0xfb   :  { %7738 = vmatmul.mubr.f32.gmra.mxu1 %v8584_v19  ;;  %7938 = vmatprep.subr.mxu1 %v8504_v15  ;;  %v846_v31 = vpop.f32.mrf.mxu1  ;;  %v853_v49 = vadd.f32 %v7277_v30, %v7267_v14 }
  0xfc   :  { %v7284_v18 = vpop.f32.mrf.mxu0  ;;  %v4935_v32 = vand.u32 4294901760, %v4934_v27  ;;  %v9428_v33 = vand.u32 4294901760, %v8601_v26  ;;  %v4964_v37 = vsub.f32 %v8590_v22, %v9427_v29  ;;  %v847_v54 = vadd.f32 %v846_v31, %v743_v28 }
  0xfd   :  { %v7294_v41 = vpop.f32.mrf.mxu1  ;;  %v936_v45 = vadd.f32 %v7284_v18, %v841_v35 }
  0xfe   :  { %v928_v39 = vpop.f32.mrf.mxu0  ;;  %7682 = vmatprep.mubr.f32.mxu0 %v4935_v32  ;;  %v4954_v43 = vsub.f32 %v8601_v26, %v9428_v33  ;;  %v4965_v51 = vand.u32 4294901760, %v4964_v37 }
  0xff   :  { %7683 = vmatmul.mubr.f32.vlgmr.msra.gmra.mxu0 %v4945_v34  ;;  %v1024_v47 = vpop.f32.mrf.mxu1  ;;  %v929_v50 = vadd.f32 %v928_v39, %v835_v44  ;;  %v1033_v55 = vadd.f32 %v7294_v41, %v936_v45 }
 0x100   :  { %v7287_v46 = vpop.f32.mrf.mxu0  ;;  %v4955_v48 = vand.u32 4294901760, %v4954_v43  ;;  %7783 = vmatpush3.msra.mxu0 %v8516_v25 }
 0x101   :  { %7784 = vmatprep.subr.mxu0 %v8524_v36  ;;  %v7297_v53 = vpop.f32.mrf.mxu1  ;;  %v950_v56 = vadd.f32 %v7287_v46, %v853_v49  ;;  %v1025_v59 = vadd.f32 %v1024_v47, %v929_v50 }
 0x102   :  { %v942_v52 = vpop.f32.mrf.mxu0  ;;  %7685 = vmatprep.mubr.f32.mxu0 %v4955_v48  ;;  %7785 = vmatpush3.msra.mxu0 %v8524_v36 }
 0x103   :  { %7686 = vmatmul.mubr.f32.gmra.mxu0 %v4965_v51  ;;  %7886 = vmatprep.subr.mxu0 %v8528_v38  ;;  %v1040_v57 = vpop.f32.mrf.mxu1  ;;  %v943_v25 = vadd.f32 %v942_v52, %v847_v54  ;;  %v1049_v0 = vadd.f32 %v7297_v53, %v950_v56 }
 0x104   :  { %v7304_v58 = vpop.f32.mrf.mxu0 }
 0x105   :  { %v1132_v60 = vadd.f32 %v7304_v58, %v1033_v55  ;;  %v7314_v62 = vpop.f32.mrf.mxu1  ;;  %v1041_v7 = vadd.f32 %v1040_v57, %v943_v25 }
 0x106   :  { %v1125_v61 = vpop.f32.mrf.mxu0 }
 0x107   :  { %v1126_v1 = vadd.f32 %v1125_v61, %v1025_v59  ;;  %v1223_v2 = vadd.f32 %v7314_v62, %v1132_v60  ;;  %v1216_v4 = vpop.f32.mrf.mxu1 }
 0x108   :  { %v7307_v3 = vpop.f32.mrf.mxu0 }
 0x109   :  { %v4784_v36 = vsel %vm49_vm0, %v1223_v2, 0  ;;  %v1144_v8 = vadd.f32 %v7307_v3, %v1049_v0  ;;  %v1217_v10 = vadd.f32 %v1216_v4, %v1126_v1  ;;  %v7317_v17 = vpop.f32.mrf.mxu1 }
 0x10a   :  { %v8623_v11 = vand.u32 4294901760, %v4784_v36  ;;  %v1137_v42 = vpop.f32.mrf.mxu0 }
 0x10b   :  { %v4781_v20 = vsel %vm49_vm0, %v1217_v10, 0  ;;  %v1138_v14 = vadd.f32 %v1137_v42, %v1041_v7  ;;  %v1235_v16 = vadd.f32 %v7317_v17, %v1144_v8  ;;  %v1228_v30 = vpop.f32.mrf.mxu1 }
 0x10c   :  { %9499 = vst [vmem:[#allocation10_spill] sm:$0xff] %v8623_v11  ;;  %v8627_v24 = vsub.f32 %v4784_v36, %v8623_v11  ;;  %v8629_v28 = vand.u32 4294901760, %v4781_v20  ;;  %v7324_v27 = vpop.f32.mrf.mxu0 }
 0x10d   :  { %v4790_v31 = vsel %vm49_vm0, %v1235_v16, 0  ;;  %v1229_v18 = vadd.f32 %v1228_v30, %v1138_v14  ;;  %v7334_v37 = vpop.f32.mrf.mxu1 }
 0x10e   :  { %9500 = vst [vmem:[#allocation11_spill] sm:$0xff] %v8629_v28  ;;  %v8633_v32 = vsub.f32 %v4781_v20, %v8629_v28  ;;  %v8635_v34 = vand.u32 4294901760, %v4790_v31  ;;  %v1311_v35 = vpop.f32.mrf.mxu0  ;;  %7740 = vmatprep.mubr.f32.mxu1 %v8629_v28  ;;  %v9425_v39 = vand.u32 4294901760, %v8627_v24  ;;  %v1429_v58 = vadd.f32 %v7334_v37, %v7324_v27 }
 0x10f   :  { %v4787_v41 = vsel %vm49_vm0, %v1229_v18, 0  ;;  %7741 = vmatmul.mubr.f32.gmra.mxu1 %v8623_v11  ;;  %v1422_v46 = vpop.f32.mrf.mxu1 }
 0x110   :  { %9501 = vst [vmem:[#allocation12_spill] sm:$0xff] %v8635_v34  ;;  %v8642_v43 = vsub.f32 %v4790_v31, %v8635_v34  ;;  %v8644_v44 = vand.u32 4294901760, %v4787_v41  ;;  %v7327_v45 = vpop.f32.mrf.mxu0  ;;  %v9426_v47 = vand.u32 4294901760, %v8633_v32  ;;  %v4984_v48 = vsub.f32 %v8627_v24, %v9425_v39 }
 0x111   :  { %v7337_v51 = vpop.f32.mrf.mxu1  ;;  %v1423_v0 = vadd.f32 %v1422_v46, %v1311_v35 }
 0x112   :  { %9502 = vst [vmem:[#allocation13_spill] sm:$0xff] %v8644_v44  ;;  %v8651_v49 = vsub.f32 %v4787_v41, %v8644_v44  ;;  %v1331_v50 = vpop.f32.mrf.mxu0  ;;  %7743 = vmatprep.mubr.f32.mxu1 %v8644_v44  ;;  %v4974_v52 = vsub.f32 %v8633_v32, %v9426_v47  ;;  %v9420_v53 = vand.u32 4294901760, %v8642_v43  ;;  %v4985_v59 = vand.u32 4294901760, %v4984_v48 }
 0x113   :  { %7744 = vmatmul.mubr.f32.gmra.mxu1 %v8635_v34  ;;  %v1434_v54 = vpop.f32.mrf.mxu1  ;;  %v1441_v7 = vadd.f32 %v7337_v51, %v7327_v45 }
 0x114   :  { %v7344_v55 = vpop.f32.mrf.mxu0  ;;  %v4975_v56 = vand.u32 4294901760, %v4974_v52  ;;  %v9421_v57 = vand.u32 4294901760, %v8651_v49  ;;  %v5004_v25 = vsub.f32 %v8642_v43, %v9420_v53  ;;  %v1435_v17 = vadd.f32 %v1434_v54, %v1331_v50 }
 0x115   :  { %v7354_v61 = vpop.f32.mrf.mxu1  ;;  %v1524_v1 = vadd.f32 %v7344_v55, %v1429_v58 }
 0x116   :  { %v1516_v60 = vpop.f32.mrf.mxu0  ;;  %7688 = vmatprep.mubr.f32.mxu0 %v4975_v56  ;;  %v4994_v62 = vsub.f32 %v8651_v49, %v9421_v57  ;;  %v5005_v8 = vand.u32 4294901760, %v5004_v25 }
 0x117   :  { %7689 = vmatmul.mubr.f32.gmra.mxu0 %v4985_v59  ;;  %v1612_v3 = vpop.f32.mrf.mxu1  ;;  %v1517_v36 = vadd.f32 %v1516_v60, %v1423_v0  ;;  %v1621_v20 = vadd.f32 %v7354_v61, %v1524_v1 }
 0x118   :  { %v7347_v2 = vpop.f32.mrf.mxu0  ;;  %v4995_v4 = vand.u32 4294901760, %v4994_v62 }
 0x119   :  { %v7357_v42 = vpop.f32.mrf.mxu1  ;;  %v1538_v14 = vadd.f32 %v7347_v2, %v1441_v7  ;;  %v1613_v27 = vadd.f32 %v1612_v3, %v1517_v36 }
 0x11a   :  { %v1530_v10 = vpop.f32.mrf.mxu0  ;;  %7691 = vmatprep.mubr.f32.mxu0 %v4995_v4 }
 0x11b   :  { %7692 = vmatmul.mubr.f32.gmra.mxu0 %v5005_v8  ;;  %v1628_v16 = vpop.f32.mrf.mxu1  ;;  %v1531_v31 = vadd.f32 %v1530_v10, %v1435_v17  ;;  %v1637_v41 = vadd.f32 %v7357_v42, %v1538_v14 }
 0x11c   :  { %v7364_v30 = vpop.f32.mrf.mxu0 }
 0x11d   :  { %v1720_v18 = vadd.f32 %v7364_v30, %v1621_v20  ;;  %v7374_v37 = vpop.f32.mrf.mxu1  ;;  %v1629_v52 = vadd.f32 %v1628_v16, %v1531_v31 }
 0x11e   :  { %v1713_v35 = vpop.f32.mrf.mxu0 }
 0x11f   :  { %v1714_v46 = vadd.f32 %v1713_v35, %v1613_v27  ;;  %v1811_v48 = vadd.f32 %v7374_v37, %v1720_v18  ;;  %v1804_v51 = vpop.f32.mrf.mxu1 }
 0x120   :  { %v7367_v45 = vpop.f32.mrf.mxu0 }
 0x121   :  { %v4796_v55 = vsel %vm49_vm0, %v1811_v48, 0  ;;  %v1732_v56 = vadd.f32 %v7367_v45, %v1637_v41  ;;  %v1805_v50 = vadd.f32 %v1804_v51, %v1714_v46  ;;  %v7377_v59 = vpop.f32.mrf.mxu1 }
 0x122   :  { %v8667_v54 = vand.u32 4294901760, %v4796_v55  ;;  %v1725_v58 = vpop.f32.mrf.mxu0 }
 0x123   :  { %v4793_v25 = vsel %vm49_vm0, %v1805_v50, 0  ;;  %v1726_v60 = vadd.f32 %v1725_v58, %v1629_v52  ;;  %v1823_v61 = vadd.f32 %v7377_v59, %v1732_v56  ;;  %v1816_v1 = vpop.f32.mrf.mxu1 }
 0x124   :  { %9503 = vst [vmem:[#allocation14_spill] sm:$0xff] %v8667_v54  ;;  %v8671_v62 = vsub.f32 %v4796_v55, %v8667_v54  ;;  %v8673_v0 = vand.u32 4294901760, %v4793_v25  ;;  %v7384_v2 = vpop.f32.mrf.mxu0 }
 0x125   :  { %v4802_v3 = vsel %vm49_vm0, %v1823_v61, 0  ;;  %v1817_v4 = vadd.f32 %v1816_v1, %v1726_v60  ;;  %v7394_v10 = vpop.f32.mrf.mxu1 }
 0x126   :  { %9504 = vst [vmem:[#allocation15_spill] sm:$0xff] %v8673_v0  ;;  %v8677_v7 = vsub.f32 %v4793_v25, %v8673_v0  ;;  %v8679_v36 = vand.u32 4294901760, %v4802_v3  ;;  %v1899_v8 = vpop.f32.mrf.mxu0  ;;  %7746 = vmatprep.mubr.f32.mxu1 %v8673_v0  ;;  %v9418_v42 = vand.u32 4294901760, %v8671_v62  ;;  %v2017_v55 = vadd.f32 %v7394_v10, %v7384_v2 }
 0x127   :  { %v4799_v17 = vsel %vm49_vm0, %v1817_v4, 0  ;;  %7747 = vmatmul.mubr.f32.gmra.mxu1 %v8667_v54  ;;  %v2010_v30 = vpop.f32.mrf.mxu1 }
 0x128   :  { %9505 = vst [vmem:[#allocation16_spill] sm:$0xff] %v8679_v36  ;;  %v8686_v20 = vsub.f32 %v4802_v3, %v8679_v36  ;;  %v8688_v14 = vand.u32 4294901760, %v4799_v17  ;;  %v7387_v16 = vpop.f32.mrf.mxu0  ;;  %v9419_v27 = vand.u32 4294901760, %v8677_v7  ;;  %v5024_v31 = vsub.f32 %v8671_v62, %v9418_v42 }
 0x129   :  { %v7397_v37 = vpop.f32.mrf.mxu1  ;;  %v2011_v60 = vadd.f32 %v2010_v30, %v1899_v8 }
 0x12a   :  { %9506 = vst [vmem:[#allocation17_spill] sm:$0xff] %v8688_v14  ;;  %v8695_v18 = vsub.f32 %v4799_v17, %v8688_v14  ;;  %v1919_v35 = vpop.f32.mrf.mxu0  ;;  %7749 = vmatprep.mubr.f32.mxu1 %v8688_v14  ;;  %v5014_v41 = vsub.f32 %v8677_v7, %v9419_v27  ;;  %v9417_v46 = vand.u32 4294901760, %v8686_v20  ;;  %v5025_v56 = vand.u32 4294901760, %v5024_v31 }
 0x12b   :  { %7750 = vmatmul.mubr.f32.gmra.mxu1 %v8679_v36  ;;  %v2022_v48 = vpop.f32.mrf.mxu1  ;;  %v2029_v17 = vadd.f32 %v7397_v37, %v7387_v16 }
 0x12c   :  { %v7404_v45 = vpop.f32.mrf.mxu0  ;;  %v5015_v51 = vand.u32 4294901760, %v5014_v41  ;;  %v9422_v52 = vand.u32 4294901760, %v8695_v18  ;;  %v5044_v50 = vsub.f32 %v8686_v20, %v9417_v46  ;;  %v2023_v46 = vadd.f32 %v2022_v48, %v1919_v35 }
 0x12d   :  { %v7414_v59 = vpop.f32.mrf.mxu1  ;;  %v2112_v61 = vadd.f32 %v7404_v45, %v2017_v55 }
 0x12e   :  { %v2104_v58 = vpop.f32.mrf.mxu0  ;;  %7694 = vmatprep.mubr.f32.mxu0 %v5015_v51  ;;  %v5034_v25 = vsub.f32 %v8695_v18, %v9422_v52  ;;  %v5045_v10 = vand.u32 4294901760, %v5044_v50 }
 0x12f   :  { %7695 = vmatmul.mubr.f32.gmra.mxu0 %v5025_v56  ;;  %v2200_v3 = vpop.f32.mrf.mxu1  ;;  %v2105_v2 = vadd.f32 %v2104_v58, %v2011_v60  ;;  %v2209_v42 = vadd.f32 %v7414_v59, %v2112_v61 }
 0x130   :  { %v7407_v1 = vpop.f32.mrf.mxu0  ;;  %v5035_v4 = vand.u32 4294901760, %v5034_v25 }
 0x131   :  { %v7417_v41 = vpop.f32.mrf.mxu1  ;;  %v2126_v27 = vadd.f32 %v7407_v1, %v2029_v17  ;;  %v2201_v57 = vadd.f32 %v2200_v3, %v2105_v2 }
 0x132   :  { %v2118_v31 = vpop.f32.mrf.mxu0  ;;  %7697 = vmatprep.mubr.f32.mxu0 %v5035_v4 }
 0x133   :  { %7698 = vmatmul.mubr.f32.gmra.mxu0 %v5045_v10  ;;  %v2216_v51 = vpop.f32.mrf.mxu1  ;;  %v2119_v52 = vadd.f32 %v2118_v31, %v2023_v46  ;;  %v2225_v55 = vadd.f32 %v7417_v41, %v2126_v27 }
 0x134   :  { %v7424_v53 = vpop.f32.mrf.mxu0 }
 0x135   :  { %v2308_v8 = vadd.f32 %v7424_v53, %v2209_v42  ;;  %v7434_v45 = vpop.f32.mrf.mxu1  ;;  %v2217_v50 = vadd.f32 %v2216_v51, %v2119_v52 }
 0x136   :  { %v2301_v30 = vpop.f32.mrf.mxu0 }
 0x137   :  { %v2302_v56 = vadd.f32 %v2301_v30, %v2201_v57  ;;  %v2399_v25 = vadd.f32 %v7434_v45, %v2308_v8  ;;  %v2392_v37 = vpop.f32.mrf.mxu1 }
 0x138   :  { %v7427_v16 = vpop.f32.mrf.mxu0 }
 0x139   :  { %v4808_v58 = vsel %vm49_vm0, %v2399_v25, 0  ;;  %v2320_v60 = vadd.f32 %v7427_v16, %v2225_v55  ;;  %v2393_v35 = vadd.f32 %v2392_v37, %v2302_v56  ;;  %v7437_v61 = vpop.f32.mrf.mxu1 }
 0x13a   :  { %v8711_v48 = vand.u32 4294901760, %v4808_v58  ;;  %v2313_v59 = vpop.f32.mrf.mxu0 }
 0x13b   :  { %v4805_v1 = vsel %vm49_vm0, %v2393_v35, 0  ;;  %v2314_v46 = vadd.f32 %v2313_v59, %v2217_v50  ;;  %v2411_v53 = vadd.f32 %v7437_v61, %v2320_v60  ;;  %v2404_v27 = vpop.f32.mrf.mxu1 }
 0x13c   :  { %9507 = vst [vmem:[#allocation18_spill] sm:$0xff] %v8711_v48  ;;  %v8715_v42 = vsub.f32 %v4808_v58, %v8711_v48  ;;  %v8717_v57 = vand.u32 4294901760, %v4805_v1  ;;  %v7444_v3 = vpop.f32.mrf.mxu0 }
 0x13d   :  { %v4814_v52 = vsel %vm49_vm0, %v2411_v53, 0  ;;  %v2405_v4 = vadd.f32 %v2404_v27, %v2314_v46  ;;  %v7454_v31 = vpop.f32.mrf.mxu1 }
 0x13e   :  { %9508 = vst [vmem:[#allocation19_spill] sm:$0xff] %v8717_v57  ;;  %v8721_v17 = vsub.f32 %v4805_v1, %v8717_v57  ;;  %v8723_v2 = vand.u32 4294901760, %v4814_v52  ;;  %v2487_v10 = vpop.f32.mrf.mxu0  ;;  %7752 = vmatprep.mubr.f32.mxu1 %v8717_v57  ;;  %v9423_v41 = vand.u32 4294901760, %v8715_v42  ;;  %v2605_v46 = vadd.f32 %v7454_v31, %v7444_v3 }
 0x13f   :  { %v4811_v51 = vsel %vm49_vm0, %v2405_v4, 0  ;;  %7753 = vmatmul.mubr.f32.gmra.mxu1 %v8711_v48  ;;  %v2598_v55 = vpop.f32.mrf.mxu1 }
 0x140   :  { %9509 = vst [vmem:[#allocation20_spill] sm:$0xff] %v8723_v2  ;;  %v8730_v8 = vsub.f32 %v4814_v52, %v8723_v2  ;;  %v8732_v30 = vand.u32 4294901760, %v4811_v51  ;;  %v7447_v45 = vpop.f32.mrf.mxu0  ;;  %v9424_v56 = vand.u32 4294901760, %v8721_v17  ;;  %v5064_v25 = vsub.f32 %v8715_v42, %v9423_v41 }
 0x141   :  { %v7457_v50 = vpop.f32.mrf.mxu1  ;;  %v2599_v41 = vadd.f32 %v2598_v55, %v2487_v10 }
 0x142   :  { %9510 = vst [vmem:[#allocation21_spill] sm:$0xff] %v8732_v30  ;;  %v8739_v16 = vsub.f32 %v4811_v51, %v8732_v30  ;;  %v2507_v37 = vpop.f32.mrf.mxu0  ;;  %7755 = vmatprep.mubr.f32.mxu1 %v8732_v30  ;;  %v5054_v58 = vsub.f32 %v8721_v17, %v9424_v56  ;;  %v9429_v60 = vand.u32 4294901760, %v8730_v8  ;;  %v5065_v53 = vand.u32 4294901760, %v5064_v25 }
 0x143   :  { %7756 = vmatmul.mubr.f32.gmra.mxu1 %v8723_v2  ;;  %v2610_v35 = vpop.f32.mrf.mxu1  ;;  %v2617_v29 = vadd.f32 %v7457_v50, %v7447_v45 }
 0x144   :  { %v7464_v59 = vpop.f32.mrf.mxu0  ;;  %v5055_v61 = vand.u32 4294901760, %v5054_v58  ;;  %v9436_v1 = vand.u32 4294901760, %v8739_v16  ;;  %v5084_v27 = vsub.f32 %v8730_v8, %v9429_v60  ;;  %v2611_v60 = vadd.f32 %v2610_v35, %v2507_v37 }
 0x145   :  { %v7474_v4 = vpop.f32.mrf.mxu1  ;;  %v2700_v56 = vadd.f32 %v7464_v59, %v2605_v46 }
 0x146   :  { %v2692_v52 = vpop.f32.mrf.mxu0  ;;  %7700 = vmatprep.mubr.f32.mxu0 %v5055_v61  ;;  %v5074_v51 = vsub.f32 %v8739_v16, %v9436_v1  ;;  %v5085_v31 = vand.u32 4294901760, %v5084_v27 }
 0x147   :  { %7701 = vmatmul.mubr.f32.gmra.mxu0 %v5065_v53  ;;  %v2788_v58 = vpop.f32.mrf.mxu1  ;;  %v2693_v3 = vadd.f32 %v2692_v52, %v2599_v41  ;;  %v2797_v12 = vadd.f32 %v7474_v4, %v2700_v56 }
 0x148   :  { %v7467_v39 = vpop.f32.mrf.mxu0  ;;  %v5075_v47 = vand.u32 4294901760, %v5074_v51 }
 0x149   :  { %v7477_v33 = vpop.f32.mrf.mxu1  ;;  %v2714_v23 = vadd.f32 %v7467_v39, %v2617_v29  ;;  %v2789_v30 = vadd.f32 %v2788_v58, %v2693_v3 }
 0x14a   :  { %v2706_v25 = vpop.f32.mrf.mxu0  ;;  %7703 = vmatprep.mubr.f32.mxu0 %v5075_v47 }
 0x14b   :  { %7704 = vmatmul.mubr.f32.gmra.mxu0 %v5085_v31  ;;  %v2804_v61 = vpop.f32.mrf.mxu1  ;;  %v2707_v1 = vadd.f32 %v2706_v25, %v2611_v60  ;;  %v2813_v46 = vadd.f32 %v7477_v33, %v2714_v23 }
 0x14c   :  { %v7484_v2 = vpop.f32.mrf.mxu0 }
 0x14d   :  { %v2896_v10 = vadd.f32 %v7484_v2, %v2797_v12  ;;  %v7494_v59 = vpop.f32.mrf.mxu1  ;;  %v2805_v50 = vadd.f32 %v2804_v61, %v2707_v1 }
 0x14e   :  { %v2889_v55 = vpop.f32.mrf.mxu0 }
 0x14f   :  { %v2890_v53 = vadd.f32 %v2889_v55, %v2789_v30  ;;  %v2987_v51 = vadd.f32 %v7494_v59, %v2896_v10  ;;  %v2980_v41 = vpop.f32.mrf.mxu1 }
 0x150   :  { %v7487_v45 = vpop.f32.mrf.mxu0 }
 0x151   :  { %v4820_v27 = vsel %vm49_vm0, %v2987_v51, 0  ;;  %v2908_v47 = vadd.f32 %v7487_v45, %v2813_v46  ;;  %v2981_v37 = vadd.f32 %v2980_v41, %v2890_v53  ;;  %v7497_v39 = vpop.f32.mrf.mxu1 }
 0x152   :  { %v8755_v56 = vand.u32 4294901760, %v4820_v27  ;;  %v2901_v29 = vpop.f32.mrf.mxu0 }
 0x153   :  { %v4817_v35 = vsel %vm49_vm0, %v2981_v37, 0  ;;  %v2902_v60 = vadd.f32 %v2901_v29, %v2805_v50  ;;  %v2999_v12 = vadd.f32 %v7497_v39, %v2908_v47  ;;  %v2992_v33 = vpop.f32.mrf.mxu1 }
 0x154   :  { %9511 = vst [vmem:[#allocation22_spill] sm:$0xff] %v8755_v56  ;;  %v8759_v2 = vsub.f32 %v4820_v27, %v8755_v56  ;;  %v8761_v23 = vand.u32 4294901760, %v4817_v35  ;;  %v7504_v30 = vpop.f32.mrf.mxu0 }
 0x155   :  { %v4826_v1 = vsel %vm49_vm0, %v2999_v12, 0  ;;  %v2993_v52 = vadd.f32 %v2992_v33, %v2902_v60  ;;  %v7514_v25 = vpop.f32.mrf.mxu1 }
 0x156   :  { %9512 = vst [vmem:[#allocation23_spill] sm:$0xff] %v8761_v23  ;;  %v9437_v4 = vand.u32 4294901760, %v8759_v2  ;;  %v8766_v58 = vsub.f32 %v4817_v35, %v8761_v23  ;;  %v8768_v3 = vand.u32 4294901760, %v4826_v1  ;;  %v3075_v31 = vpop.f32.mrf.mxu0  ;;  %7758 = vmatprep.mubr.f32.mxu1 %v8761_v23  ;;  %v3193_v60 = vadd.f32 %v7514_v25, %v7504_v30 }
 0x157   :  { %v4823_v61 = vsel %vm49_vm0, %v2993_v52, 0  ;;  %7759 = vmatmul.mubr.f32.gmra.mxu1 %v8755_v56  ;;  %v3186_v46 = vpop.f32.mrf.mxu1 }
 0x158   :  { %9513 = vst [vmem:[#allocation24_spill] sm:$0xff] %v8768_v3  ;;  %v8774_v10 = vsub.f32 %v4826_v1, %v8768_v3  ;;  %v8776_v55 = vand.u32 4294901760, %v4823_v61  ;;  %v7507_v59 = vpop.f32.mrf.mxu0  ;;  %v9438_v53 = vand.u32 4294901760, %v8766_v58  ;;  %v5104_v51 = vsub.f32 %v8759_v2, %v9437_v4 }
 0x159   :  { %v7517_v27 = vpop.f32.mrf.mxu1  ;;  %v3187_v4 = vadd.f32 %v3186_v46, %v3075_v31 }
 0x15a   :  { %9514 = vst [vmem:[#allocation25_spill] sm:$0xff] %v8776_v55  ;;  %v9447_v45 = vand.u32 4294901760, %v8774_v10  ;;  %v8784_v41 = vsub.f32 %v4823_v61, %v8776_v55  ;;  %v3095_v50 = vpop.f32.mrf.mxu0  ;;  %7761 = vmatprep.mubr.f32.mxu1 %v8776_v55  ;;  %v5094_v47 = vsub.f32 %v8766_v58, %v9438_v53  ;;  %v5105_v12 = vand.u32 4294901760, %v5104_v51 }
 0x15b   :  { %7762 = vmatmul.mubr.f32.gmra.mxu1 %v8768_v3  ;;  %v3198_v37 = vpop.f32.mrf.mxu1  ;;  %v3205_v56 = vadd.f32 %v7517_v27, %v7507_v59 }
 0x15c   :  { %v7524_v29 = vpop.f32.mrf.mxu0  ;;  %v5095_v39 = vand.u32 4294901760, %v5094_v47  ;;  %v9456_v35 = vand.u32 4294901760, %v8784_v41  ;;  %v5124_v33 = vsub.f32 %v8774_v10, %v9447_v45  ;;  %v3199_v45 = vadd.f32 %v3198_v37, %v3095_v50 }
 0x15d   :  { %v7534_v52 = vpop.f32.mrf.mxu1  ;;  %v3288_v53 = vadd.f32 %v7524_v29, %v3193_v60 }
 0x15e   :  { %v3280_v1 = vpop.f32.mrf.mxu0  ;;  %7706 = vmatprep.mubr.f32.mxu0 %v5095_v39  ;;  %v5114_v61 = vsub.f32 %v8784_v41, %v9456_v35  ;;  %v5125_v25 = vand.u32 4294901760, %v5124_v33 }
 0x15f   :  { %7707 = vmatmul.mubr.f32.gmra.mxu0 %v5105_v12  ;;  %v3376_v47 = vpop.f32.mrf.mxu1  ;;  %v3281_v30 = vadd.f32 %v3280_v1, %v3187_v4  ;;  %v3385_v48 = vadd.f32 %v7534_v52, %v3288_v53 }
 0x160   :  { %v7527_v3 = vpop.f32.mrf.mxu0  ;;  %v5115_v55 = vand.u32 4294901760, %v5114_v61 }
 0x161   :  { %v7537_v23 = vpop.f32.mrf.mxu1  ;;  %v3302_v57 = vadd.f32 %v7527_v3, %v3205_v56  ;;  %v3377_v14 = vadd.f32 %v3376_v47, %v3281_v30 }
 0x162   :  { %v3294_v51 = vpop.f32.mrf.mxu0  ;;  %7709 = vmatprep.mubr.f32.mxu0 %v5115_v55 }
 0x163   :  { %7710 = vmatmul.mubr.f32.gmra.mxu0 %v5125_v25  ;;  %v3392_v39 = vpop.f32.mrf.mxu1  ;;  %v3295_v35 = vadd.f32 %v3294_v51, %v3199_v45  ;;  %v3401_v60 = vadd.f32 %v7537_v23, %v3302_v57 }
 0x164   :  { %v7544_v36 = vpop.f32.mrf.mxu0 }
 0x165   :  { %v3484_v31 = vadd.f32 %v7544_v36, %v3385_v48  ;;  %v7554_v29 = vpop.f32.mrf.mxu1  ;;  %v3393_v27 = vadd.f32 %v3392_v39, %v3295_v35 }
 0x166   :  { %v3477_v46 = vpop.f32.mrf.mxu0 }
 0x167   :  { %v3478_v12 = vadd.f32 %v3477_v46, %v3377_v14  ;;  %v3575_v61 = vadd.f32 %v7554_v29, %v3484_v31  ;;  %v3568_v4 = vpop.f32.mrf.mxu1 }
 0x168   :  { %v7547_v59 = vpop.f32.mrf.mxu0 }
 0x169   :  { %v4832_v33 = vsel %vm49_vm0, %v3575_v61, 0  ;;  %v3496_v55 = vadd.f32 %v7547_v59, %v3401_v60  ;;  %v3569_v50 = vadd.f32 %v3568_v4, %v3478_v12  ;;  %v7557_v3 = vpop.f32.mrf.mxu1 }
 0x16a   :  { %v8799_v53 = vand.u32 4294901760, %v4832_v33  ;;  %v3489_v56 = vpop.f32.mrf.mxu0 }
 0x16b   :  { %v4829_v37 = vsel %vm49_vm0, %v3569_v50, 0  ;;  %v3490_v45 = vadd.f32 %v3489_v56, %v3393_v27  ;;  %v3587_v36 = vadd.f32 %v7557_v3, %v3496_v55  ;;  %v3580_v57 = vpop.f32.mrf.mxu1 }
 0x16c   :  { %9515 = vst [vmem:[#allocation26_spill] sm:$0xff] %v8799_v53  ;;  %v8803_v48 = vsub.f32 %v4832_v33, %v8799_v53  ;;  %v8805_v14 = vand.u32 4294901760, %v4829_v37  ;;  %v7564_v23 = vpop.f32.mrf.mxu0 }
 0x16d   :  { %v4838_v35 = vsel %vm49_vm0, %v3587_v36, 0  ;;  %v3581_v1 = vadd.f32 %v3580_v57, %v3490_v45  ;;  %v7574_v51 = vpop.f32.mrf.mxu1 }
 0x16e   :  { %9516 = vst [vmem:[#allocation27_spill] sm:$0xff] %v8805_v14  ;;  %v9457_v52 = vand.u32 4294901760, %v8803_v48  ;;  %v8810_v47 = vsub.f32 %v4829_v37, %v8805_v14  ;;  %v8812_v30 = vand.u32 4294901760, %v4838_v35  ;;  %v3663_v25 = vpop.f32.mrf.mxu0  ;;  %7764 = vmatprep.mubr.f32.mxu1 %v8805_v14  ;;  %v3781_v45 = vadd.f32 %v7574_v51, %v7564_v23 }
 0x16f   :  { %v4835_v39 = vsel %vm49_vm0, %v3581_v1, 0  ;;  %7765 = vmatmul.mubr.f32.gmra.mxu1 %v8799_v53  ;;  %v3774_v60 = vpop.f32.mrf.mxu1 }
 0x170   :  { %9517 = vst [vmem:[#allocation28_spill] sm:$0xff] %v8812_v30  ;;  %v8818_v31 = vsub.f32 %v4838_v35, %v8812_v30  ;;  %v8820_v46 = vand.u32 4294901760, %v4835_v39  ;;  %v7567_v29 = vpop.f32.mrf.mxu0  ;;  %v9458_v12 = vand.u32 4294901760, %v8810_v47  ;;  %v5144_v61 = vsub.f32 %v8803_v48, %v9457_v52 }
 0x171   :  { %v7577_v33 = vpop.f32.mrf.mxu1  ;;  %v3775_v52 = vadd.f32 %v3774_v60, %v3663_v25 }
 0x172   :  { %9518 = vst [vmem:[#allocation29_spill] sm:$0xff] %v8820_v46  ;;  %v9467_v59 = vand.u32 4294901760, %v8818_v31  ;;  %v8828_v4 = vsub.f32 %v4835_v39, %v8820_v46  ;;  %v3683_v27 = vpop.f32.mrf.mxu0  ;;  %7767 = vmatprep.mubr.f32.mxu1 %v8820_v46  ;;  %v5134_v55 = vsub.f32 %v8810_v47, %v9458_v12  ;;  %v5145_v36 = vand.u32 4294901760, %v5144_v61 }
 0x173   :  { %7768 = vmatmul.mubr.f32.gmra.mxu1 %v8812_v30  ;;  %v3786_v50 = vpop.f32.mrf.mxu1  ;;  %v3793_v53 = vadd.f32 %v7577_v33, %v7567_v29 }
 0x174   :  { %v7584_v56 = vpop.f32.mrf.mxu0  ;;  %v5135_v3 = vand.u32 4294901760, %v5134_v55  ;;  %v9476_v37 = vand.u32 4294901760, %v8828_v4  ;;  %v5164_v57 = vsub.f32 %v8818_v31, %v9467_v59  ;;  %v3787_v59 = vadd.f32 %v3786_v50, %v3683_v27 }
 0x175   :  { %v7594_v1 = vpop.f32.mrf.mxu1  ;;  %v3876_v12 = vadd.f32 %v7584_v56, %v3781_v45 }
 0x176   :  { %v3868_v35 = vpop.f32.mrf.mxu0  ;;  %7712 = vmatprep.mubr.f32.mxu0 %v5135_v3  ;;  %v5154_v39 = vsub.f32 %v8828_v4, %v9476_v37  ;;  %v5165_v51 = vand.u32 4294901760, %v5164_v57 }
 0x177   :  { %7713 = vmatmul.mubr.f32.gmra.mxu0 %v5145_v36  ;;  %v3964_v55 = vpop.f32.mrf.mxu1  ;;  %v3869_v23 = vadd.f32 %v3868_v35, %v3775_v52  ;;  %v3973_v54 = vadd.f32 %v7594_v1, %v3876_v12 }
 0x178   :  { %v7587_v30 = vpop.f32.mrf.mxu0  ;;  %v5155_v46 = vand.u32 4294901760, %v5154_v39 }
 0x179   :  { %v7597_v14 = vpop.f32.mrf.mxu1  ;;  %v3890_v0 = vadd.f32 %v7587_v30, %v3793_v53  ;;  %v3965_v44 = vadd.f32 %v3964_v55, %v3869_v23 }
 0x17a   :  { %v3882_v61 = vpop.f32.mrf.mxu0  ;;  %7715 = vmatprep.mubr.f32.mxu0 %v5155_v46 }
 0x17b   :  { %7716 = vmatmul.mubr.f32.gmra.mxu0 %v5165_v51  ;;  %v3980_v3 = vpop.f32.mrf.mxu1  ;;  %v3883_v37 = vadd.f32 %v3882_v61, %v3787_v59  ;;  %v3989_v45 = vadd.f32 %v7597_v14, %v3890_v0 }
 0x17c   :  { %v7604_v34 = vpop.f32.mrf.mxu0 }
 0x17d   :  { %v4072_v25 = vadd.f32 %v7604_v34, %v3973_v54  ;;  %v7614_v56 = vpop.f32.mrf.mxu1  ;;  %v3981_v33 = vadd.f32 %v3980_v3, %v3883_v37 }
 0x17e   :  { %v4065_v60 = vpop.f32.mrf.mxu0 }
 0x17f   :  { %v4066_v36 = vadd.f32 %v4065_v60, %v3965_v44  ;;  %v4163_v39 = vadd.f32 %v7614_v56, %v4072_v25  ;;  %v4156_v52 = vpop.f32.mrf.mxu1 }
 0x180   :  { %v7607_v29 = vpop.f32.mrf.mxu0 }
 0x181   :  { %v4844_v57 = vsel %vm49_vm0, %v4163_v39, 0  ;;  %v4084_v46 = vadd.f32 %v7607_v29, %v3989_v45  ;;  %v4157_v27 = vadd.f32 %v4156_v52, %v4066_v36  ;;  %v7617_v30 = vpop.f32.mrf.mxu1 }
 0x182   :  { %v8843_v12 = vand.u32 4294901760, %v4844_v57  ;;  %v4077_v53 = vpop.f32.mrf.mxu0 }
 0x183   :  { %v4841_v50 = vsel %vm49_vm0, %v4157_v27, 0  ;;  %v4078_v59 = vadd.f32 %v4077_v53, %v3981_v33  ;;  %v4175_v34 = vadd.f32 %v7617_v30, %v4084_v46  ;;  %v4168_v0 = vpop.f32.mrf.mxu1 }
 0x184   :  { %9519 = vst [vmem:[#allocation30_spill] sm:$0xff] %v8843_v12  ;;  %v8847_v54 = vsub.f32 %v4844_v57, %v8843_v12  ;;  %v8849_v44 = vand.u32 4294901760, %v4841_v50  ;;  %v7624_v14 = vpop.f32.mrf.mxu0 }
 0x185   :  { %v4850_v37 = vsel %vm49_vm0, %v4175_v34, 0  ;;  %v4169_v35 = vadd.f32 %v4168_v0, %v4078_v59  ;;  %v7634_v61 = vpop.f32.mrf.mxu1 }
 0x186   :  { %9520 = vst [vmem:[#allocation31_spill] sm:$0xff] %v8849_v44  ;;  %v9477_v1 = vand.u32 4294901760, %v8847_v54  ;;  %v8854_v55 = vsub.f32 %v4841_v50, %v8849_v44  ;;  %v8856_v23 = vand.u32 4294901760, %v4850_v37  ;;  %v4251_v51 = vpop.f32.mrf.mxu0  ;;  %7770 = vmatprep.mubr.f32.mxu1 %v8849_v44  ;;  %v4369_v59 = vadd.f32 %v7634_v61, %v7624_v14 }
 0x187   :  { %v4847_v3 = vsel %vm49_vm0, %v4169_v35, 0  ;;  %7771 = vmatmul.mubr.f32.gmra.mxu1 %v8843_v12  ;;  %v4362_v45 = vpop.f32.mrf.mxu1 }
 0x188   :  { %9521 = vst [vmem:[#allocation32_spill] sm:$0xff] %v8856_v23  ;;  %v8862_v25 = vsub.f32 %v4850_v37, %v8856_v23  ;;  %v8864_v60 = vand.u32 4294901760, %v4847_v3  ;;  %v7627_v56 = vpop.f32.mrf.mxu0  ;;  %v9478_v36 = vand.u32 4294901760, %v8854_v55  ;;  %v5184_v39 = vsub.f32 %v8847_v54, %v9477_v1 }
 0x189   :  { %v7637_v57 = vpop.f32.mrf.mxu1  ;;  %v4363_v1 = vadd.f32 %v4362_v45, %v4251_v51 }
 0x18a   :  { %9522 = vst [vmem:[#allocation33_spill] sm:$0xff] %v8864_v60  ;;  %v9487_v29 = vand.u32 4294901760, %v8862_v25  ;;  %v8872_v52 = vsub.f32 %v4847_v3, %v8864_v60  ;;  %v4271_v33 = vpop.f32.mrf.mxu0  ;;  %7773 = vmatprep.mubr.f32.mxu1 %v8864_v60  ;;  %v5174_v46 = vsub.f32 %v8854_v55, %v9478_v36  ;;  %v5185_v34 = vand.u32 4294901760, %v5184_v39 }
 0x18b   :  { %7774 = vmatmul.mubr.f32.gmra.mxu1 %v8856_v23  ;;  %v4374_v27 = vpop.f32.mrf.mxu1  ;;  %v4381_v12 = vadd.f32 %v7637_v57, %v7627_v56 }
 0x18c   :  { %v7644_v53 = vpop.f32.mrf.mxu0  ;;  %v5175_v30 = vand.u32 4294901760, %v5174_v46  ;;  %v9496_v50 = vand.u32 4294901760, %v8872_v52  ;;  %v5204_v0 = vsub.f32 %v8862_v25, %v9487_v29  ;;  %v4375_v29 = vadd.f32 %v4374_v27, %v4271_v33 }
 0x18d   :  { %v7654_v35 = vpop.f32.mrf.mxu1  ;;  %v4464_v36 = vadd.f32 %v7644_v53, %v4369_v59 }
 0x18e   :  { %v4456_v37 = vpop.f32.mrf.mxu0  ;;  %7718 = vmatprep.mubr.f32.mxu0 %v5175_v30  ;;  %v5194_v3 = vsub.f32 %v8872_v52, %v9496_v50  ;;  %v5205_v61 = vand.u32 4294901760, %v5204_v0 }
 0x18f   :  { %7719 = vmatmul.mubr.f32.gmra.mxu0 %v5185_v34  ;;  %v4552_v46 = vpop.f32.mrf.mxu1  ;;  %v4457_v14 = vadd.f32 %v4456_v37, %v4363_v1  ;;  %v4561_v11 = vadd.f32 %v7654_v35, %v4464_v36 }
 0x190   :  { %v7647_v23 = vpop.f32.mrf.mxu0  ;;  %v5195_v60 = vand.u32 4294901760, %v5194_v3 }
 0x191   :  { %v7657_v44 = vpop.f32.mrf.mxu1  ;;  %v4478_v28 = vadd.f32 %v7647_v23, %v4381_v12  ;;  %v4553_v9 = vadd.f32 %v4552_v46, %v4457_v14 }
 0x192   :  { %v4470_v39 = vpop.f32.mrf.mxu0  ;;  %7721 = vmatprep.mubr.f32.mxu0 %v5195_v60 }
 0x193   :  { %7722 = vmatmul.mubr.f32.gmra.mxu0 %v5205_v61  ;;  %v4568_v30 = vpop.f32.mrf.mxu1  ;;  %v4471_v50 = vadd.f32 %v4470_v39, %v4375_v29  ;;  %v4577_v59 = vadd.f32 %v7657_v44, %v4478_v28 }
 0x194   :  { %v7664_v19 = vpop.f32.mrf.mxu0 }
 0x195   :  { %v4660_v51 = vadd.f32 %v7664_v19, %v4561_v11  ;;  %v7674_v53 = vpop.f32.mrf.mxu1  ;;  %v4569_v57 = vadd.f32 %v4568_v30, %v4471_v50 }
 0x196   :  { %v4653_v45 = vpop.f32.mrf.mxu0 }
 0x197   :  { %v4654_v34 = vadd.f32 %v4653_v45, %v4553_v9  ;;  %v4751_v3 = vadd.f32 %v7674_v53, %v4660_v51  ;;  %v4744_v1 = vpop.f32.mrf.mxu1 }
 0x198   :  { %v7667_v56 = vpop.f32.mrf.mxu0 }
 0x199   :  { %v4856_v0 = vsel %vm49_vm0, %v4751_v3, 0  ;;  %v4672_v60 = vadd.f32 %v7667_v56, %v4577_v59  ;;  %v4745_v33 = vadd.f32 %v4744_v1, %v4654_v34  ;;  %v9523_v34 = vand.u32 4294901760, %v8582_v13 }
 0x19a   :  { %v8887_v36 = vand.u32 4294901760, %v4856_v0  ;;  %v4665_v12 = vpop.f32.mrf.mxu0  ;;  %v7677_v23 = vpop.f32.mrf.mxu1 }
 0x19b   :  { %v4853_v27 = vsel %vm49_vm0, %v4745_v33, 0  ;;  %v4666_v29 = vadd.f32 %v4665_v12, %v4569_v57  ;;  %v4763_v19 = vadd.f32 %v7677_v23, %v4672_v60  ;;  %v9524_v60 = vand.u32 4294901760, %v8575_v5 }
 0x19c   :  { %v8891_v11 = vsub.f32 %v4856_v0, %v8887_v36  ;;  %v8893_v9 = vand.u32 4294901760, %v4853_v27  ;;  %v4756_v28 = vpop.f32.mrf.mxu1  ;;  %v9525_v33 = vand.u32 4294901760, %v8601_v26 }
 0x19d   :  { %v4862_v44 = vsel %vm49_vm0, %v4763_v19, 0  ;;  %v4757_v50 = vadd.f32 %v4756_v28, %v4666_v29  ;;  %v9527_v29 = vand.u32 4294901760, %v8633_v32  ;;  %v9528_v19 = vand.u32 4294901760, %v8627_v24 }
 0x19e   :  { %v5223_v37 = vand.u32 4294901760, %v8891_v11  ;;  %v8898_v35 = vsub.f32 %v4853_v27, %v8893_v9  ;;  %v8900_v46 = vand.u32 4294901760, %v4862_v44  ;;  %7776 = vmatprep.mubr.f32.mxu1 %v8893_v9  ;;  %v9526_v27 = vand.u32 4294901760, %v8590_v22 }
 0x19f   :  { %v4859_v14 = vsel %vm49_vm0, %v4757_v50, 0  ;;  %7777 = vmatmul.mubr.f32.gmra.mxu1 %v8887_v36 }
 0x1a0   :  { %v8906_v61 = vsub.f32 %v4862_v44, %v8900_v46  ;;  %v8908_v39 = vand.u32 4294901760, %v4859_v14  ;;  %v5213_v30 = vand.u32 4294901760, %v8898_v35  ;;  %v5224_v51 = vsub.f32 %v8891_v11, %v5223_v37 }
 0x1a2   :  { %v5243_v45 = vand.u32 4294901760, %v8906_v61  ;;  %v8916_v53 = vsub.f32 %v4859_v14, %v8908_v39  ;;  %7779 = vmatprep.mubr.f32.mxu1 %v8908_v39  ;;  %v5214_v59 = vsub.f32 %v8898_v35, %v5213_v30  ;;  %v5225_v1 = vand.u32 4294901760, %v5224_v51 }
 0x1a3   :  { %7780 = vmatmul.mubr.f32.gmra.mxu1 %v8900_v46  ;;  %v9538_v51 = vand.u32 4294901760, %v8730_v8 }
 0x1a4   :  { %7838 = vmatprep.mubr.f32.mxu1 %v9523_v34  ;;  %v5215_v3 = vand.u32 4294901760, %v5214_v59  ;;  %v5233_v56 = vand.u32 4294901760, %v8916_v53  ;;  %v5244_v57 = vsub.f32 %v8906_v61, %v5243_v45  ;;  %v9539_v59 = vand.u32 4294901760, %v8766_v58 }
 0x1a6   :  { %7724 = vmatprep.mubr.f32.mxu0 %v5215_v3  ;;  %v5234_v0 = vsub.f32 %v8916_v53, %v5233_v56  ;;  %v5245_v23 = vand.u32 4294901760, %v5244_v57  ;;  %v9543_v57 = vand.u32 4294901760, %v8810_v47 }
 0x1a7   :  { %7725 = vmatmul.mubr.f32.gmra.mxu0 %v5225_v1  ;;  %7839 = vmatmul.mubr.f32.vlgmr.msra.gmra.mxu1 %v9524_v60  ;;  %v9540_v1 = vand.u32 4294901760, %v8759_v2 }
 0x1a8   :  { %7841 = vmatprep.mubr.f32.mxu1 %v9525_v33  ;;  %v5235_v12 = vand.u32 4294901760, %v5234_v0  ;;  %7939 = vmatpush3.msra.mxu1 %v8504_v15  ;;  %v9529_v15 = vand.u32 4294901760, %v8651_v49 }
 0x1a9   :  { %7940 = vmatprep.subr.mxu1 %v8512_v21 }
 0x1aa   :  { %7727 = vmatprep.mubr.f32.mxu0 %v5235_v12  ;;  %7941 = vmatpush3.msra.mxu1 %v8512_v21  ;;  %v9530_v21 = vand.u32 4294901760, %v8642_v43 }
 0x1ab   :  { %7728 = vmatmul.mubr.f32.gmra.mxu0 %v5245_v23  ;;  %7842 = vmatmul.mubr.f32.gmra.mxu1 %v9526_v27 }
 0x1ac   :  { %7786 = vmatprep.mubr.f32.mxu0 %v8582_v13  ;;  %7844 = vmatprep.mubr.f32.mxu1 %v9527_v29  ;;  %v9532_v13 = vand.u32 4294901760, %v8671_v62  ;;  %v9550_v29 = vand.u32 4294901760, %v8862_v25 }
 0x1af   :  { %7787 = vmatmul.mubr.f32.vlgmr.msra.gmra.mxu0 %v8575_v5  ;;  %7845 = vmatmul.mubr.f32.gmra.mxu1 %v9528_v19  ;;  %v9531_v5 = vand.u32 4294901760, %v8677_v7 }
 0x1b0   :  { %7789 = vmatprep.mubr.f32.mxu0 %v8601_v26  ;;  %7847 = vmatprep.mubr.f32.mxu1 %v9529_v15  ;;  %v9534_v26 = vand.u32 4294901760, %v8686_v20 }
 0x1b1   :  { %7887 = vmatpush3.msra.mxu0 %v8528_v38  ;;  %v9533_v38 = vand.u32 4294901760, %v8695_v18 }
 0x1b2   :  { %7888 = vmatprep.subr.mxu0 %v8537_v40 }
 0x1b3   :  { %7790 = vmatmul.mubr.f32.gmra.mxu0 %v8590_v22  ;;  %7848 = vmatmul.mubr.f32.gmra.mxu1 %v9530_v21 }
 0x1b4   :  { %7792 = vmatprep.mubr.f32.mxu0 %v8633_v32  ;;  %7850 = vmatprep.mubr.f32.mxu1 %v9531_v5 }
 0x1b5   :  { %7889 = vmatpush3.msra.mxu0 %v8537_v40  ;;  %v9535_v40 = vand.u32 4294901760, %v8721_v17 }
 0x1b7   :  { %7793 = vmatmul.mubr.f32.gmra.mxu0 %v8627_v24  ;;  %7851 = vmatmul.mubr.f32.gmra.mxu1 %v9532_v13  ;;  %v7736_v22 = vpop.f32.mrf.mxu1 }
 0x1b8   :  { %7795 = vmatprep.mubr.f32.mxu0 %v8651_v49  ;;  %7853 = vmatprep.mubr.f32.mxu1 %v9533_v38  ;;  %v9536_v49 = vand.u32 4294901760, %v8715_v42 }
 0x1b9   :  { %v5328_v24 = vpop.f32.mrf.mxu1 }
 0x1bb   :  { %7796 = vmatmul.mubr.f32.gmra.mxu0 %v8642_v43  ;;  %7854 = vmatmul.mubr.f32.gmra.mxu1 %v9534_v26  ;;  %v9537_v43 = vand.u32 4294901760, %v8739_v16  ;;  %v7739_v44 = vpop.f32.mrf.mxu1  ;;  %v9559_v26 = vld [vmem:[#allocation17_spill] sm:$0xff] }
 0x1bc   :  { %7798 = vmatprep.mubr.f32.mxu0 %v8677_v7  ;;  %7856 = vmatprep.mubr.f32.mxu1 %v9535_v40  ;;  %v9560_v40 = vld [vmem:[#allocation16_spill] sm:$0xff] }
 0x1bf   :  { %v7684_v32 = vpop.f32.mrf.mxu0  ;;  %7799 = vmatmul.mubr.f32.gmra.mxu0 %v8671_v62  ;;  %7857 = vmatmul.mubr.f32.gmra.mxu1 %v9536_v49  ;;  %v9563_v49 = vld [vmem:[#allocation21_spill] sm:$0xff] }
 0x1c0   :  { %v8974_v28 = vadd.f32 %v7736_v22, %v7684_v32  ;;  %7801 = vmatprep.mubr.f32.mxu0 %v8695_v18  ;;  %7859 = vmatprep.mubr.f32.mxu1 %v9537_v43  ;;  %v5340_v18 = vpop.f32.mrf.mxu1  ;;  %v9558_v22 = vld [vmem:[#allocation14_spill] sm:$0xff] }
 0x1c1   :  { %v4937_v50 = vpop.f32.mrf.mxu0  ;;  %v9562_v32 = vld [vmem:[#allocation18_spill] sm:$0xff] }
 0x1c2   :  { %v8979_v7 = vadd.f32 %v5328_v24, %v4937_v50  ;;  %v9561_v24 = vld [vmem:[#allocation19_spill] sm:$0xff] }
 0x1c3   :  { %v7687_v14 = vpop.f32.mrf.mxu0  ;;  %7802 = vmatmul.mubr.f32.gmra.mxu0 %v8686_v20  ;;  %7860 = vmatmul.mubr.f32.gmra.mxu1 %v9538_v51  ;;  %v9541_v20 = vand.u32 4294901760, %v8784_v41  ;;  %v9565_v50 = vld [vmem:[#allocation23_spill] sm:$0xff] }
 0x1c4   :  { %v8984_v62 = vadd.f32 %v7739_v44, %v7687_v14  ;;  %7804 = vmatprep.mubr.f32.mxu0 %v8721_v17  ;;  %7862 = vmatprep.mubr.f32.mxu1 %v9539_v59  ;;  %v9542_v17 = vand.u32 4294901760, %v8774_v10  ;;  %v9564_v44 = vld [vmem:[#allocation20_spill] sm:$0xff]  ;;  %v9566_v59 = vld [vmem:[#allocation22_spill] sm:$0xff] }
 0x1c5   :  { %v4957_v34 = vpop.f32.mrf.mxu0 }
 0x1c6   :  { %v8989_v3 = vadd.f32 %v5340_v18, %v4957_v34  ;;  %v9567_v34 = vld [vmem:[#allocation25_spill] sm:$0xff] }
 0x1c7   :  { %7805 = vmatmul.mubr.f32.gmra.mxu0 %v8715_v42  ;;  %7863 = vmatmul.mubr.f32.gmra.mxu1 %v9540_v1  ;;  %v9544_v42 = vand.u32 4294901760, %v8803_v48 }
 0x1c8   :  { %7807 = vmatprep.mubr.f32.mxu0 %v8739_v16  ;;  %7865 = vmatprep.mubr.f32.mxu1 %v9541_v20  ;;  %v9545_v16 = vand.u32 4294901760, %v8828_v4 }
 0x1cb   :  { %7808 = vmatmul.mubr.f32.gmra.mxu0 %v8730_v8  ;;  %7866 = vmatmul.mubr.f32.gmra.mxu1 %v9542_v17  ;;  %v9546_v8 = vand.u32 4294901760, %v8818_v31 }
 0x1cc   :  { %7810 = vmatprep.mubr.f32.mxu0 %v8766_v58  ;;  %7868 = vmatprep.mubr.f32.mxu1 %v9543_v57  ;;  %v9547_v58 = vand.u32 4294901760, %v8854_v55 }
 0x1cf   :  { %7811 = vmatmul.mubr.f32.gmra.mxu0 %v8759_v2  ;;  %7869 = vmatmul.mubr.f32.gmra.mxu1 %v9544_v42  ;;  %v7742_v0 = vpop.f32.mrf.mxu1  ;;  %v9568_v42 = vld [vmem:[#allocation24_spill] sm:$0xff] }
 0x1d0   :  { %7813 = vmatprep.mubr.f32.mxu0 %v8784_v41  ;;  %7871 = vmatprep.mubr.f32.mxu1 %v9545_v16  ;;  %v9548_v41 = vand.u32 4294901760, %v8847_v54 }
 0x1d1   :  { %v5352_v2 = vpop.f32.mrf.mxu1 }
 0x1d3   :  { %7814 = vmatmul.mubr.f32.gmra.mxu0 %v8774_v10  ;;  %7872 = vmatmul.mubr.f32.gmra.mxu1 %v9546_v8  ;;  %v9549_v10 = vand.u32 4294901760, %v8872_v52  ;;  %v7745_v12 = vpop.f32.mrf.mxu1 }
 0x1d4   :  { %7816 = vmatprep.mubr.f32.mxu0 %v8810_v47  ;;  %7874 = vmatprep.mubr.f32.mxu1 %v9547_v58 }
 0x1d7   :  { %v7690_v60 = vpop.f32.mrf.mxu0  ;;  %7817 = vmatmul.mubr.f32.gmra.mxu0 %v8803_v48  ;;  %7875 = vmatmul.mubr.f32.gmra.mxu1 %v9548_v41  ;;  %v9571_v41 = vld [vmem:[#allocation29_spill] sm:$0xff] }
 0x1d8   :  { %v9018_v33 = vadd.f32 %v7742_v0, %v7690_v60  ;;  %7819 = vmatprep.mubr.f32.mxu0 %v8828_v4  ;;  %7877 = vmatprep.mubr.f32.mxu1 %v9549_v10  ;;  %v5364_v4 = vpop.f32.mrf.mxu1  ;;  %v9569_v0 = vld [vmem:[#allocation27_spill] sm:$0xff]  ;;  %v9570_v60 = vld [vmem:[#allocation26_spill] sm:$0xff]  ;;  %v9572_v10 = vld [vmem:[#allocation28_spill] sm:$0xff] }
 0x1d9   :  { %v4977_v23 = vpop.f32.mrf.mxu0 }
 0x1da   :  { %v9023_v47 = vadd.f32 %v5352_v2, %v4977_v23  ;;  %v9574_v23 = vld [vmem:[#allocation30_spill] sm:$0xff] }
 0x1db   :  { %v7693_v27 = vpop.f32.mrf.mxu0  ;;  %7820 = vmatmul.mubr.f32.gmra.mxu0 %v8818_v31  ;;  %7878 = vmatmul.mubr.f32.gmra.mxu1 %v9550_v29  ;;  %v9551_v31 = vld [vmem:[#allocation9_spill] sm:$0xff] }
 0x1dc   :  { %v9028_v48 = vadd.f32 %v7745_v12, %v7693_v27  ;;  %7822 = vmatprep.mubr.f32.mxu0 %v8854_v55  ;;  %7880 = vmatprep.mubr.f32.mxu1 %v5213_v30  ;;  %v9552_v55 = vld [vmem:[#allocation8_spill] sm:$0xff]  ;;  %v9555_v30 = vld [vmem:[#allocation13_spill] sm:$0xff]  ;;  %v9573_v12 = vld [vmem:[#allocation31_spill] sm:$0xff] }
 0x1dd   :  { %v4997_v19 = vpop.f32.mrf.mxu0  ;;  %v9575_v27 = vld [vmem:[#allocation33_spill] sm:$0xff] }
 0x1de   :  { %v9033_v15 = vadd.f32 %v5364_v4, %v4997_v19  ;;  %v9576_v4 = vld [vmem:[#allocation32_spill] sm:$0xff] }
 0x1df   :  { %7823 = vmatmul.mubr.f32.gmra.mxu0 %v8847_v54  ;;  %7881 = vmatmul.mubr.f32.gmra.mxu1 %v5223_v37 }
 0x1e0   :  { %7825 = vmatprep.mubr.f32.mxu0 %v8872_v52  ;;  %7883 = vmatprep.mubr.f32.mxu1 %v5233_v56 }
 0x1e3   :  { %7826 = vmatmul.mubr.f32.gmra.mxu0 %v8862_v25  ;;  %7884 = vmatmul.mubr.f32.gmra.mxu1 %v5243_v45  ;;  %v9553_v25 = vld [vmem:[#allocation11_spill] sm:$0xff] }
 0x1e4   :  { %7828 = vmatprep.mubr.f32.mxu0 %v8898_v35  ;;  %7942 = vmatprep.mubr.f32.mxu1 %v8577_v6 }
 0x1e7   :  { %7829 = vmatmul.mubr.f32.gmra.mxu0 %v8891_v11  ;;  %7943 = vmatmul.mubr.f32.vlgmr.msra.gmra.mxu1 %v8571_v63  ;;  %v7748_v54 = vpop.f32.mrf.mxu1  ;;  %v9554_v11 = vld [vmem:[#allocation10_spill] sm:$0xff] }
 0x1e8   :  { %7831 = vmatprep.mubr.f32.mxu0 %v8916_v53  ;;  %7945 = vmatprep.mubr.f32.mxu1 %v9551_v31 }
 0x1e9   :  { %v5376_v52 = vpop.f32.mrf.mxu1 }
 0x1eb   :  { %7832 = vmatmul.mubr.f32.gmra.mxu0 %v8906_v61  ;;  %7946 = vmatmul.mubr.f32.gmra.mxu1 %v9552_v55  ;;  %v7751_v45 = vpop.f32.mrf.mxu1 }
 0x1ec   :  { %7890 = vmatprep.mubr.f32.mxu0 %v8577_v6  ;;  %7948 = vmatprep.mubr.f32.mxu1 %v9553_v25  ;;  %v9556_v6 = vld [vmem:[#allocation12_spill] sm:$0xff] }
 0x1ed   :  { %v5388_v5 = vpop.f32.mrf.mxu1 }
 0x1ef   :  { %v7696_v37 = vpop.f32.mrf.mxu0  ;;  %7891 = vmatmul.mubr.f32.vlgmr.msra.gmra.mxu0 %v8571_v63  ;;  %7949 = vmatmul.mubr.f32.gmra.mxu1 %v9554_v11  ;;  %v9557_v63 = vld [vmem:[#allocation15_spill] sm:$0xff] }
 0x1f0   :  { %v9056_v35 = vadd.f32 %v7748_v54, %v7696_v37  ;;  %7893 = vmatprep.mubr.f32.mxu0 %v9551_v31  ;;  %7951 = vmatprep.mubr.f32.mxu1 %v9555_v30 }
 0x1f1   :  { %v5017_v61 = vpop.f32.mrf.mxu0 }
 0x1f2   :  { %v9060_v53 = vadd.f32 %v5376_v52, %v5017_v61 }
 0x1f3   :  { %v7699_v56 = vpop.f32.mrf.mxu0  ;;  %7894 = vmatmul.mubr.f32.gmra.mxu0 %v9552_v55  ;;  %7952 = vmatmul.mubr.f32.gmra.mxu1 %v9556_v6 }
 0x1f4   :  { %v9064_v21 = vadd.f32 %v7751_v45, %v7699_v56  ;;  %7896 = vmatprep.mubr.f32.mxu0 %v9553_v25  ;;  %7954 = vmatprep.mubr.f32.mxu1 %v9557_v63 }
 0x1f5   :  { %v5037_v13 = vpop.f32.mrf.mxu0 }
 0x1f6   :  { %v9068_v38 = vadd.f32 %v5388_v5, %v5037_v13 }
 0x1f7   :  { %7897 = vmatmul.mubr.f32.gmra.mxu0 %v9554_v11  ;;  %7955 = vmatmul.mubr.f32.gmra.mxu1 %v9558_v22 }
 0x1f8   :  { %7899 = vmatprep.mubr.f32.mxu0 %v9555_v30  ;;  %7957 = vmatprep.mubr.f32.mxu1 %v9559_v26 }
 0x1fb   :  { %7900 = vmatmul.mubr.f32.gmra.mxu0 %v9556_v6  ;;  %7958 = vmatmul.mubr.f32.gmra.mxu1 %v9560_v40 }
 0x1fc   :  { %7902 = vmatprep.mubr.f32.mxu0 %v9557_v63  ;;  %7960 = vmatprep.mubr.f32.mxu1 %v9561_v24 }
 0x1ff   :  { %7903 = vmatmul.mubr.f32.gmra.mxu0 %v9558_v22  ;;  %7961 = vmatmul.mubr.f32.gmra.mxu1 %v9562_v32  ;;  %v7754_v43 = vpop.f32.mrf.mxu1 }
 0x200   :  { %7905 = vmatprep.mubr.f32.mxu0 %v9559_v26  ;;  %7963 = vmatprep.mubr.f32.mxu1 %v9563_v49 }
 0x201   :  { %v5400_v14 = vpop.f32.mrf.mxu1 }
 0x203   :  { %7906 = vmatmul.mubr.f32.gmra.mxu0 %v9560_v40  ;;  %7964 = vmatmul.mubr.f32.gmra.mxu1 %v9564_v44  ;;  %v7757_v1 = vpop.f32.mrf.mxu1 }
 0x204   :  { %7908 = vmatprep.mubr.f32.mxu0 %v9561_v24  ;;  %7966 = vmatprep.mubr.f32.mxu1 %v9565_v50 }
 0x205   :  { %v5412_v8 = vpop.f32.mrf.mxu1 }
 0x207   :  { %v7702_v51 = vpop.f32.mrf.mxu0  ;;  %7909 = vmatmul.mubr.f32.gmra.mxu0 %v9562_v32  ;;  %7967 = vmatmul.mubr.f32.gmra.mxu1 %v9566_v59 }
 0x208   :  { %v9088_v18 = vadd.f32 %v7754_v43, %v7702_v51  ;;  %7911 = vmatprep.mubr.f32.mxu0 %v9563_v49  ;;  %7969 = vmatprep.mubr.f32.mxu1 %v9567_v34 }
 0x209   :  { %v5057_v20 = vpop.f32.mrf.mxu0 }
 0x20a   :  { %v9092_v17 = vadd.f32 %v5400_v14, %v5057_v20 }
 0x20b   :  { %v7705_v57 = vpop.f32.mrf.mxu0  ;;  %7912 = vmatmul.mubr.f32.gmra.mxu0 %v9564_v44  ;;  %7970 = vmatmul.mubr.f32.gmra.mxu1 %v9568_v42 }
 0x20c   :  { %v9096_v16 = vadd.f32 %v7757_v1, %v7705_v57  ;;  %7914 = vmatprep.mubr.f32.mxu0 %v9565_v50  ;;  %7972 = vmatprep.mubr.f32.mxu1 %v9569_v0 }
 0x20d   :  { %v5077_v58 = vpop.f32.mrf.mxu0 }
 0x20e   :  { %v9100_v2 = vadd.f32 %v5412_v8, %v5077_v58 }
 0x20f   :  { %7915 = vmatmul.mubr.f32.gmra.mxu0 %v9566_v59  ;;  %7973 = vmatmul.mubr.f32.gmra.mxu1 %v9570_v60 }
 0x210   :  { %7917 = vmatprep.mubr.f32.mxu0 %v9567_v34  ;;  %7975 = vmatprep.mubr.f32.mxu1 %v9571_v41 }
 0x213   :  { %7918 = vmatmul.mubr.f32.gmra.mxu0 %v9568_v42  ;;  %7976 = vmatmul.mubr.f32.gmra.mxu1 %v9572_v10 }
 0x214   :  { %7920 = vmatprep.mubr.f32.mxu0 %v9569_v0  ;;  %7978 = vmatprep.mubr.f32.mxu1 %v9573_v12 }
 0x217   :  { %7921 = vmatmul.mubr.f32.gmra.mxu0 %v9570_v60  ;;  %7979 = vmatmul.mubr.f32.gmra.mxu1 %v9574_v23  ;;  %v7760_v29 = vpop.f32.mrf.mxu1 }
 0x218   :  { %7923 = vmatprep.mubr.f32.mxu0 %v9571_v41  ;;  %7981 = vmatprep.mubr.f32.mxu1 %v9575_v27 }
 0x219   :  { %v5424_v19 = vpop.f32.mrf.mxu1 }
 0x21b   :  { %7924 = vmatmul.mubr.f32.gmra.mxu0 %v9572_v10  ;;  %7982 = vmatmul.mubr.f32.gmra.mxu1 %v9576_v4  ;;  %v7763_v55 = vpop.f32.mrf.mxu1 }
 0x21c   :  { %7926 = vmatprep.mubr.f32.mxu0 %v9573_v12  ;;  %7984 = vmatprep.mubr.f32.mxu1 %v8893_v9 }
 0x21d   :  { %v5436_v30 = vpop.f32.mrf.mxu1 }
 0x21f   :  { %v7708_v31 = vpop.f32.mrf.mxu0  ;;  %7927 = vmatmul.mubr.f32.gmra.mxu0 %v9574_v23  ;;  %7985 = vmatmul.mubr.f32.gmra.mxu1 %v8887_v36 }
 0x220   :  { %v9120_v54 = vadd.f32 %v7760_v29, %v7708_v31  ;;  %7929 = vmatprep.mubr.f32.mxu0 %v9575_v27  ;;  %7987 = vmatprep.mubr.f32.mxu1 %v8908_v39 }
 0x221   :  { %v5097_v25 = vpop.f32.mrf.mxu0 }
 0x222   :  { %v9124_v52 = vadd.f32 %v5424_v19, %v5097_v25 }
 0x223   :  { %v7711_v37 = vpop.f32.mrf.mxu0  ;;  %7930 = vmatmul.mubr.f32.gmra.mxu0 %v9576_v4  ;;  %7988 = vmatmul.mubr.f32.gmra.mxu1 %v8900_v46 }
 0x224   :  { %v9128_v11 = vadd.f32 %v7763_v55, %v7711_v37  ;;  %7932 = vmatprep.mubr.f32.mxu0 %v8893_v9 }
 0x225   :  { %v5117_v45 = vpop.f32.mrf.mxu0 }
 0x226   :  { %9577 = vst [vmem:[#allocation9_spill] sm:$0xff] %v9128_v11  ;;  %v9131_v61 = vadd.f32 %v5436_v30, %v5117_v45 }
 0x227   :  { %7933 = vmatmul.mubr.f32.gmra.mxu0 %v8887_v36 }
 0x228   :  { %9578 = vst [vmem:[#allocation8_spill] sm:$0xff] %v9131_v61  ;;  %7935 = vmatprep.mubr.f32.mxu0 %v8908_v39 }
 0x22b   :  { %7936 = vmatmul.mubr.f32.gmra.mxu0 %v8900_v46 }
 0x22f   :  { %v7766_v56 = vpop.f32.mrf.mxu1 }
 0x231   :  { %v5448_v6 = vpop.f32.mrf.mxu1 }
 0x233   :  { %v7769_v13 = vpop.f32.mrf.mxu1 }
 0x235   :  { %v5460_v24 = vpop.f32.mrf.mxu1 }
 0x237   :  { %v7714_v63 = vpop.f32.mrf.mxu0 }
 0x238   :  { %v9136_v5 = vadd.f32 %v7766_v56, %v7714_v63 }
 0x239   :  { %v5137_v22 = vpop.f32.mrf.mxu0 }
 0x23a   :  { %9579 = vst [vmem:[#allocation11_spill] sm:$0xff] %v9136_v5  ;;  %v9138_v26 = vadd.f32 %v5448_v6, %v5137_v22 }
 0x23b   :  { %v7717_v9 = vpop.f32.mrf.mxu0 }
 0x23c   :  { %9580 = vst [vmem:[#allocation10_spill] sm:$0xff] %v9138_v26  ;;  %v9140_v40 = vadd.f32 %v7769_v13, %v7717_v9 }
 0x23d   :  { %v5157_v32 = vpop.f32.mrf.mxu0 }
 0x23e   :  { %9581 = vst [vmem:[#allocation13_spill] sm:$0xff] %v9140_v40  ;;  %v9142_v49 = vadd.f32 %v5460_v24, %v5157_v32 }
 0x240   :  { %9582 = vst [vmem:[#allocation12_spill] sm:$0xff] %v9142_v49 }
 0x247   :  { %v7772_v36 = vpop.f32.mrf.mxu1 }
 0x249   :  { %v5472_v39 = vpop.f32.mrf.mxu1 }
 0x24b   :  { %v7775_v44 = vpop.f32.mrf.mxu1 }
 0x24d   :  { %v5484_v34 = vpop.f32.mrf.mxu1 }
 0x24f   :  { %v7720_v43 = vpop.f32.mrf.mxu0 }
 0x250   :  { %v9144_v46 = vadd.f32 %v7772_v36, %v7720_v43 }
 0x251   :  { %v5177_v50 = vpop.f32.mrf.mxu0 }
 0x252   :  { %9583 = vst [vmem:[#allocation15_spill] sm:$0xff] %v9144_v46  ;;  %v9146_v14 = vadd.f32 %v5472_v39, %v5177_v50 }
 0x253   :  { %v7723_v51 = vpop.f32.mrf.mxu0 }
 0x254   :  { %9584 = vst [vmem:[#allocation14_spill] sm:$0xff] %v9146_v14  ;;  %v9148_v59 = vadd.f32 %v7775_v44, %v7723_v51 }
 0x255   :  { %v5197_v1 = vpop.f32.mrf.mxu0 }
 0x256   :  { %9585 = vst [vmem:[#allocation17_spill] sm:$0xff] %v9148_v59  ;;  %v9150_v20 = vadd.f32 %v5484_v34, %v5197_v1 }
 0x258   :  { %9586 = vst [vmem:[#allocation16_spill] sm:$0xff] %v9150_v20 }
 0x25f   :  { %v7778_v57 = vpop.f32.mrf.mxu1 }
 0x261   :  { %v5496_v42 = vpop.f32.mrf.mxu1 }
 0x263   :  { %v7781_v0 = vpop.f32.mrf.mxu1 }
 0x265   :  { %v5508_v8 = vpop.f32.mrf.mxu1 }
 0x267   :  { %v7726_v58 = vpop.f32.mrf.mxu0  ;;  %v9152_v60 = vpop.f32.mrf.mxu1 }
 0x268   :  { %v9154_v41 = vadd.f32 %v7778_v57, %v7726_v58 }
 0x269   :  { %v5217_v10 = vpop.f32.mrf.mxu0  ;;  %v9156_v12 = vpop.f32.mrf.mxu1 }
 0x26a   :  { %9587 = vst [vmem:[#allocation19_spill] sm:$0xff] %v9154_v41  ;;  %v9158_v23 = vadd.f32 %v5496_v42, %v5217_v10 }
 0x26b   :  { %v7729_v27 = vpop.f32.mrf.mxu0  ;;  %v9160_v29 = vpop.f32.mrf.mxu1 }
 0x26c   :  { %9588 = vst [vmem:[#allocation18_spill] sm:$0xff] %v9158_v23  ;;  %v9162_v4 = vadd.f32 %v7781_v0, %v7729_v27 }
 0x26d   :  { %v5237_v19 = vpop.f32.mrf.mxu0  ;;  %v9164_v31 = vpop.f32.mrf.mxu1 }
 0x26e   :  { %9589 = vst [vmem:[#allocation21_spill] sm:$0xff] %v9162_v4  ;;  %v9166_v55 = vadd.f32 %v5508_v8, %v5237_v19 }
 0x26f   :  { %v7788_v25 = vpop.f32.mrf.mxu0  ;;  %v9168_v37 = vpop.f32.mrf.mxu1 }
 0x270   :  { %9590 = vst [vmem:[#allocation20_spill] sm:$0xff] %v9166_v55 }
 0x271   :  { %v5590_v30 = vpop.f32.mrf.mxu0  ;;  %v9170_v45 = vpop.f32.mrf.mxu1 }
 0x273   :  { %v7791_v56 = vpop.f32.mrf.mxu0  ;;  %v9172_v6 = vpop.f32.mrf.mxu1 }
 0x275   :  { %v9174_v63 = vpop.f32.mrf.mxu0  ;;  %v9176_v13 = vpop.f32.mrf.mxu1 }
 0x277   :  { %v9178_v22 = vpop.f32.mrf.mxu0  ;;  %v9180_v9 = vpop.f32.mrf.mxu1 }
 0x279   :  { %v9182_v24 = vpop.f32.mrf.mxu0  ;;  %v9184_v32 = vpop.f32.mrf.mxu1 }
 0x27b   :  { %v9186_v36 = vpop.f32.mrf.mxu0  ;;  %v9188_v39 = vpop.f32.mrf.mxu1 }
 0x27d   :  { %v9190_v43 = vpop.f32.mrf.mxu0  ;;  %v9192_v44 = vpop.f32.mrf.mxu1 }
 0x27f   :  { %v9194_v50 = vpop.f32.mrf.mxu0  ;;  %v9196_v51 = vpop.f32.mrf.mxu1 }
 0x281   :  { %v9198_v34 = vpop.f32.mrf.mxu0  ;;  %v9200_v1 = vpop.f32.mrf.mxu1 }
 0x283   :  { %v9202_v57 = vpop.f32.mrf.mxu0  ;;  %v9204_v42 = vpop.f32.mrf.mxu1 }
 0x285   :  { %v9206_v0 = vpop.f32.mrf.mxu0  ;;  %v9208_v8 = vpop.f32.mrf.mxu1 }
 0x286   :  { %9591 = vst [vmem:[#allocation23_spill] sm:$0xff] %v9208_v8 }
 0x287   :  { %v9210_v58 = vpop.f32.mrf.mxu0  ;;  %v9212_v10 = vpop.f32.mrf.mxu1 }
 0x288   :  { %9592 = vst [vmem:[#allocation22_spill] sm:$0xff] %v9212_v10 }
 0x289   :  { %v9214_v27 = vpop.f32.mrf.mxu0  ;;  %v9216_v19 = vpop.f32.mrf.mxu1 }
 0x28a   :  { %9593 = vst [vmem:[#allocation25_spill] sm:$0xff] %v9216_v19 }
 0x28b   :  { %v9218_v55 = vpop.f32.mrf.mxu0  ;;  %v9220_v4 = vpop.f32.mrf.mxu1 }
 0x28c   :  { %9594 = vst [vmem:[#allocation24_spill] sm:$0xff] %v9220_v4 }
 0x28d   :  { %v9222_v23 = vpop.f32.mrf.mxu0  ;;  %v9224_v41 = vpop.f32.mrf.mxu1 }
 0x28e   :  { %9595 = vst [vmem:[#allocation27_spill] sm:$0xff] %v9224_v41 }
 0x28f   :  { %v9226_v20 = vpop.f32.mrf.mxu0  ;;  %v9228_v59 = vpop.f32.mrf.mxu1 }
 0x290   :  { %9596 = vst [vmem:[#allocation26_spill] sm:$0xff] %v9228_v59 }
 0x291   :  { %v9230_v14 = vpop.f32.mrf.mxu0  ;;  %v9232_v46 = vpop.f32.mrf.mxu1 }
 0x292   :  { %9597 = vst [vmem:[#allocation29_spill] sm:$0xff] %v9230_v14  ;;  %9598 = vst [vmem:[#allocation28_spill] sm:$0xff] %v9232_v46 }
 0x293   :  { %v9234_v49 = vpop.f32.mrf.mxu0  ;;  %v9236_v40 = vpop.f32.mrf.mxu1 }
 0x294   :  { %9599 = vst [vmem:[#allocation31_spill] sm:$0xff] %v9234_v49  ;;  %9600 = vst [vmem:[#allocation30_spill] sm:$0xff] %v9236_v40 }
 0x295   :  { %v9238_v26 = vpop.f32.mrf.mxu0  ;;  %v9240_v5 = vpop.f32.mrf.mxu1 }
 0x296   :  { %9601 = vst [vmem:[#allocation33_spill] sm:$0xff] %v9238_v26  ;;  %9602 = vst [vmem:[#allocation32_spill] sm:$0xff] %v9240_v5 }
 0x297   :  { %v9242_v4 = vpop.f32.mrf.mxu0  ;;  %v9244_v19 = vpop.f32.mrf.mxu1 }
 0x298   :  { %9603 = vst [vmem:[#allocation34_spill] sm:$0xff] %v9242_v4  ;;  %9604 = vst [vmem:[#allocation35_spill] sm:$0xff] %v9244_v19 }
 0x299   :  { %v9246_v41 = vpop.f32.mrf.mxu0  ;;  %v9248_v61 = vpop.f32.mrf.mxu1 }
 0x29a   :  { %9605 = vst [vmem:[#allocation36_spill] sm:$0xff] %v9246_v41  ;;  %9606 = vst [vmem:[#allocation37_spill] sm:$0xff] %v9248_v61 }
 0x29b   :  { %v9250_v59 = vpop.f32.mrf.mxu0  ;;  %v9252_v10 = vpop.f32.mrf.mxu1 }
 0x29c   :  { %9607 = vst [vmem:[#allocation38_spill] sm:$0xff] %v9250_v59  ;;  %9608 = vst [vmem:[#allocation39_spill] sm:$0xff] %v9252_v10 }
 0x29d   :  { %v9254_v46 = vpop.f32.mrf.mxu0  ;;  %v9256_v49 = vpop.f32.mrf.mxu1 }
 0x29e   :  { %9609 = vst [vmem:[#allocation40_spill] sm:$0xff] %v9254_v46  ;;  %9610 = vst [vmem:[#allocation41_spill] sm:$0xff] %v9256_v49 }
 0x29f   :  { %v9258_v40 = vpop.f32.mrf.mxu0  ;;  %v9260_v26 = vpop.f32.mrf.mxu1 }
 0x2a0   :  { %9611 = vst [vmem:[#allocation42_spill] sm:$0xff] %v9258_v40  ;;  %9612 = vst [vmem:[#allocation43_spill] sm:$0xff] %v9260_v26  ;;  %v5598_v26 = vadd.f32 %v7788_v25, %v8974_v28 }
 0x2a1   :  { %v9262_v5 = vpop.f32.mrf.mxu0  ;;  %v9264_v4 = vpop.f32.mrf.mxu1 }
 0x2a2   :  { %9613 = vst [vmem:[#allocation44_spill] sm:$0xff] %v9262_v5  ;;  %9614 = vst [vmem:[#allocation45_spill] sm:$0xff] %v9264_v4  ;;  %v5591_v4 = vadd.f32 %v5590_v30, %v8979_v7  ;;  %v5626_v7 = vadd.f32 %v9178_v22, %v9018_v33  ;;  %v5640_v33 = vadd.f32 %v9186_v36, %v9028_v48 }
 0x2a3   :  { %v9266_v19 = vpop.f32.mrf.mxu0  ;;  %v9268_v41 = vpop.f32.mrf.mxu1  ;;  %v5654_v48 = vadd.f32 %v9194_v50, %v9056_v35  ;;  %v5668_v35 = vadd.f32 %v9202_v57, %v9064_v21  ;;  %v5682_v21 = vadd.f32 %v9210_v58, %v9088_v18  ;;  %v5696_v18 = vadd.f32 %v9218_v55, %v9096_v16 }
 0x2a4   :  { %9615 = vst [vmem:[#allocation46_spill] sm:$0xff] %v9266_v19  ;;  %9616 = vst [vmem:[#allocation47_spill] sm:$0xff] %v9268_v41  ;;  %v5883_v28 = vadd.f32 %v9156_v12, %v5591_v4  ;;  %v5939_v36 = vadd.f32 %v9172_v6, %v5640_v33  ;;  %v5710_v16 = vadd.f32 %v9226_v20, %v9120_v54  ;;  %v9625_v54 = vld [vmem:[#allocation9_spill] sm:$0xff]  ;;  %v9626_v20 = vld [vmem:[#allocation31_spill] sm:$0xff] }
 0x2a5   :  { %v9270_v61 = vpop.f32.mrf.mxu0  ;;  %v9272_v59 = vpop.f32.mrf.mxu1  ;;  %v5987_v33 = vadd.f32 %v9196_v51, %v5682_v21 }
 0x2a6   :  { %9617 = vst [vmem:[#allocation48_spill] sm:$0xff] %v9270_v61  ;;  %9618 = vst [vmem:[#allocation49_spill] sm:$0xff] %v9272_v59  ;;  %v5612_v61 = vadd.f32 %v7791_v56, %v8984_v62  ;;  %v5891_v59 = vadd.f32 %v9152_v60, %v5598_v26  ;;  %v5619_v60 = vadd.f32 %v9182_v24, %v9023_v47 }
 0x2a7   :  { %v9274_v10 = vpop.f32.mrf.mxu0  ;;  %v7944_v46 = vpop.f32.mrf.mxu1  ;;  %v5633_v47 = vadd.f32 %v9190_v43, %v9033_v15  ;;  %v5647_v15 = vadd.f32 %v9198_v34, %v9060_v53  ;;  %v5661_v53 = vadd.f32 %v9206_v0, %v9068_v38  ;;  %v5675_v38 = vadd.f32 %v9214_v27, %v9092_v17 }
 0x2a8   :  { %9619 = vst [vmem:[#allocation50_spill] sm:$0xff] %v9274_v10  ;;  %v5907_v62 = vadd.f32 %v9160_v29, %v5612_v61  ;;  %v5689_v17 = vadd.f32 %v9222_v23, %v9100_v2  ;;  %v9623_v2 = vld [vmem:[#allocation29_spill] sm:$0xff] }
 0x2a9   :  { %v9276_v49 = vpop.f32.mrf.mxu0  ;;  %v6466_v40 = vpop.f32.mrf.mxu1  ;;  %v5931_v43 = vadd.f32 %v9176_v13, %v5633_v47  ;;  %v5947_v34 = vadd.f32 %v9184_v32, %v5647_v15  ;;  %v6003_v47 = vadd.f32 %v9204_v42, %v5696_v18  ;;  %v5703_v23 = vadd.f32 %v9623_v2, %v9124_v52  ;;  %v9628_v52 = vld [vmem:[#allocation8_spill] sm:$0xff]  ;;  %v9644_v2 = vld [vmem:[#allocation42_spill] sm:$0xff] }
 0x2aa   :  { %9620 = vst [vmem:[#allocation51_spill] sm:$0xff] %v9276_v49  ;;  %v5605_v49 = vadd.f32 %v9174_v63, %v8989_v3 }
 0x2ab   :  { %v9279_v11 = vpop.f32.mrf.mxu0  ;;  %v7947_v5 = vpop.f32.mrf.mxu1 }
 0x2ac   :  { %9621 = vst [vmem:[#allocation52_spill] sm:$0xff] %v9279_v11  ;;  %v5899_v12 = vadd.f32 %v9164_v31, %v5605_v49  ;;  %v5915_v31 = vadd.f32 %v9170_v45, %v5619_v60 }
 0x2ad   :  { %v9282_v19 = vpop.f32.mrf.mxu0  ;;  %v6478_v41 = vpop.f32.mrf.mxu1 }
 0x2ae   :  { %9622 = vst [vmem:[#allocation53_spill] sm:$0xff] %v9282_v19 }
 0x2af   :  { %v7892_v8 = vpop.f32.mrf.mxu0  ;;  %v7950_v10 = vpop.f32.mrf.mxu1 }
 0x2b0   :  { %v6214_v14 = vadd.f32 %v7892_v8, %v5891_v59 }
 0x2b1   :  { %v6207_v25 = vpop.f32.mrf.mxu0  ;;  %v6490_v11 = vpop.f32.mrf.mxu1 }
 0x2b2   :  { %v6473_v30 = vadd.f32 %v7944_v46, %v6214_v14  ;;  %v6208_v19 = vadd.f32 %v6207_v25, %v5883_v28  ;;  %v5923_v14 = vadd.f32 %v9168_v37, %v5626_v7 }
 0x2b3   :  { %v7895_v56 = vpop.f32.mrf.mxu0  ;;  %v7953_v26 = vpop.f32.mrf.mxu1 }
 0x2b4   :  { %6658 = vst.msk [vmem:[#allocation5 + $0x8] sm:$0xff] %vm6656_vm1, %v6473_v30  ;;  %v6467_v3 = vadd.f32 %v6466_v40, %v6208_v19  ;;  %v6226_v59 = vadd.f32 %v7895_v56, %v5907_v62 }
 0x2b5   :  { %v6219_v4 = vpop.f32.mrf.mxu0  ;;  %v6502_v63 = vpop.f32.mrf.mxu1 }
 0x2b6   :  { %6657 = vst.msk [vmem:[#allocation5] sm:$0xff] %vm6656_vm1, %v6467_v3  ;;  %v6485_v46 = vadd.f32 %v7947_v5, %v6226_v59  ;;  %v6220_v61 = vadd.f32 %v6219_v4, %v5899_v12  ;;  %v5963_v12 = vadd.f32 %v9192_v44, %v5661_v53 }
 0x2b7   :  { %v7898_v29 = vpop.f32.mrf.mxu0  ;;  %v7956_v22 = vpop.f32.mrf.mxu1 }
 0x2b8   :  { %6660 = vst.msk [vmem:[#allocation5 + $0x18] sm:$0xff] %vm6656_vm1, %v6485_v46  ;;  %v6479_v40 = vadd.f32 %v6478_v41, %v6220_v61  ;;  %v6238_v49 = vadd.f32 %v7898_v29, %v5923_v14  ;;  %v5979_v14 = vadd.f32 %v9200_v1, %v5675_v38  ;;  %v9636_v38 = vld [vmem:[#allocation27_spill] sm:$0xff] }
 0x2b9   :  { %v6231_v24 = vpop.f32.mrf.mxu0  ;;  %v6514_v8 = vpop.f32.mrf.mxu1 }
 0x2ba   :  { %6659 = vst.msk [vmem:[#allocation5 + $0x10] sm:$0xff] %vm6656_vm1, %v6479_v40  ;;  %v6497_v5 = vadd.f32 %v7950_v10, %v6238_v49  ;;  %v6232_v37 = vadd.f32 %v6231_v24, %v5915_v31  ;;  %v5955_v10 = vadd.f32 %v9180_v9, %v5654_v48  ;;  %v9624_v24 = vld [vmem:[#allocation23_spill] sm:$0xff] }
 0x2bb   :  { %v7901_v19 = vpop.f32.mrf.mxu0  ;;  %v7959_v28 = vpop.f32.mrf.mxu1 }
 0x2bc   :  { %6662 = vst.msk [vmem:[#allocation5 + $0x28] sm:$0xff] %vm6656_vm1, %v6497_v5  ;;  %v6491_v41 = vadd.f32 %v6490_v11, %v6232_v37  ;;  %v6250_v45 = vadd.f32 %v7901_v19, %v5939_v36  ;;  %v5724_v37 = vadd.f32 %v9626_v20, %v9625_v54  ;;  %v9627_v19 = vld [vmem:[#allocation22_spill] sm:$0xff]  ;;  %v9647_v20 = vld [vmem:[#allocation44_spill] sm:$0xff] }
 0x2bd   :  { %v6243_v25 = vpop.f32.mrf.mxu0  ;;  %v6526_v7 = vpop.f32.mrf.mxu1  ;;  %v9646_v54 = vld [vmem:[#allocation14_spill] sm:$0xff] }
 0x2be   :  { %6661 = vst.msk [vmem:[#allocation5 + $0x20] sm:$0xff] %vm6656_vm1, %v6491_v41  ;;  %v6509_v50 = vadd.f32 %v7953_v26, %v6250_v45  ;;  %v6244_v6 = vadd.f32 %v6243_v25, %v5931_v43  ;;  %v5971_v26 = vadd.f32 %v9188_v39, %v5668_v35  ;;  %v9629_v45 = vld [vmem:[#allocation33_spill] sm:$0xff] }
 0x2bf   :  { %v7904_v30 = vpop.f32.mrf.mxu0  ;;  %v7962_v62 = vpop.f32.mrf.mxu1  ;;  %v5717_v43 = vadd.f32 %v9629_v45, %v9628_v52  ;;  %v9630_v35 = vld [vmem:[#allocation25_spill] sm:$0xff]  ;;  %v9650_v52 = vld [vmem:[#allocation46_spill] sm:$0xff] }
 0x2c0   :  { %6664 = vst.msk [vmem:[#allocation5 + $0x38] sm:$0xff] %vm6656_vm1, %v6509_v50  ;;  %v6503_v11 = vadd.f32 %v6502_v63, %v6244_v6  ;;  %v6262_v13 = vadd.f32 %v7904_v30, %v5955_v10  ;;  %v6011_v50 = vadd.f32 %v9630_v35, %v5703_v23  ;;  %v9631_v30 = vld [vmem:[#allocation11_spill] sm:$0xff] }
 0x2c1   :  { %v6255_v56 = vpop.f32.mrf.mxu0  ;;  %v6538_v60 = vpop.f32.mrf.mxu1 }
 0x2c2   :  { %6663 = vst.msk [vmem:[#allocation5 + $0x30] sm:$0xff] %vm6656_vm1, %v6503_v11  ;;  %v6521_v57 = vadd.f32 %v7956_v22, %v6262_v13  ;;  %v6256_v9 = vadd.f32 %v6255_v56, %v5947_v34  ;;  %v9633_v34 = vld [vmem:[#allocation24_spill] sm:$0xff] }
 0x2c3   :  { %v7907_v3 = vpop.f32.mrf.mxu0  ;;  %v7965_v59 = vpop.f32.mrf.mxu1  ;;  %v6035_v56 = vadd.f32 %v9633_v34, %v5724_v37  ;;  %v5759_v37 = vadd.f32 %v9647_v20, %v9646_v54 }
 0x2c4   :  { %6666 = vst.msk [vmem:[#allocation5 + $0x48] sm:$0xff] %vm6656_vm1, %v6521_v57  ;;  %v6515_v0 = vadd.f32 %v6514_v8, %v6256_v9  ;;  %v6274_v32 = vadd.f32 %v7907_v3, %v5971_v26  ;;  %v5995_v8 = vadd.f32 %v9624_v24, %v5689_v17  ;;  %v9634_v57 = vld [vmem:[#allocation10_spill] sm:$0xff]  ;;  %v9635_v9 = vld [vmem:[#allocation36_spill] sm:$0xff] }
 0x2c5   :  { %v6267_v4 = vpop.f32.mrf.mxu0  ;;  %v6550_v63 = vpop.f32.mrf.mxu1  ;;  %v5731_v26 = vadd.f32 %v9635_v9, %v9634_v57 }
 0x2c6   :  { %6665 = vst.msk [vmem:[#allocation5 + $0x40] sm:$0xff] %vm6656_vm1, %v6515_v0  ;;  %v6533_v58 = vadd.f32 %v7959_v28, %v6274_v32  ;;  %v6268_v39 = vadd.f32 %v6267_v4, %v5963_v12  ;;  %v6019_v28 = vadd.f32 %v9627_v19, %v5710_v16  ;;  %v6027_v0 = vadd.f32 %v9636_v38, %v5717_v43  ;;  %v9637_v4 = vld [vmem:[#allocation13_spill] sm:$0xff]  ;;  %v9642_v16 = vld [vmem:[#allocation28_spill] sm:$0xff] }
 0x2c7   :  { %v7910_v46 = vpop.f32.mrf.mxu0  ;;  %v7968_v61 = vpop.f32.mrf.mxu1 }
 0x2c8   :  { %6668 = vst.msk [vmem:[#allocation5 + $0x58] sm:$0xff] %vm6656_vm1, %v6533_v58  ;;  %v6527_v27 = vadd.f32 %v6526_v7, %v6268_v39  ;;  %v6286_v44 = vadd.f32 %v7910_v46, %v5987_v33  ;;  %v9639_v33 = vld [vmem:[#allocation26_spill] sm:$0xff] }
 0x2c9   :  { %v6279_v29 = vpop.f32.mrf.mxu0  ;;  %v6562_v22 = vpop.f32.mrf.mxu1 }
 0x2ca   :  { %6667 = vst.msk [vmem:[#allocation5 + $0x50] sm:$0xff] %vm6656_vm1, %v6527_v27  ;;  %v6545_v55 = vadd.f32 %v7962_v62, %v6286_v44  ;;  %v6280_v51 = vadd.f32 %v6279_v29, %v5979_v14  ;;  %v9632_v62 = vld [vmem:[#allocation34_spill] sm:$0xff]  ;;  %v9640_v27 = vld [vmem:[#allocation12_spill] sm:$0xff] }
 0x2cb   :  { %v7913_v40 = vpop.f32.mrf.mxu0  ;;  %v7971_v49 = vpop.f32.mrf.mxu1  ;;  %v5738_v53 = vadd.f32 %v9632_v62, %v9631_v30  ;;  %v9641_v44 = vld [vmem:[#allocation40_spill] sm:$0xff] }
 0x2cc   :  { %6670 = vst.msk [vmem:[#allocation5 + $0x68] sm:$0xff] %vm6656_vm1, %v6545_v55  ;;  %v6539_v31 = vadd.f32 %v6538_v60, %v6280_v51  ;;  %v6298_v1 = vadd.f32 %v7913_v40, %v6003_v47  ;;  %v5745_v14 = vadd.f32 %v9641_v44, %v9640_v27  ;;  %v6043_v55 = vadd.f32 %v9642_v16, %v5731_v26  ;;  %v9643_v40 = vld [vmem:[#allocation15_spill] sm:$0xff]  ;;  %v9653_v30 = vld [vmem:[#allocation48_spill] sm:$0xff] }
 0x2cd   :  { %v6291_v48 = vpop.f32.mrf.mxu0  ;;  %v6574_v5 = vpop.f32.mrf.mxu1  ;;  %v6051_v46 = vadd.f32 %v9639_v33, %v5738_v53  ;;  %v5766_v23 = vadd.f32 %v9644_v2, %v9643_v40  ;;  %v9657_v26 = vld [vmem:[#allocation39_spill] sm:$0xff]  ;;  %v9661_v33 = vld [vmem:[#allocation21_spill] sm:$0xff]  ;;  %v9664_v16 = vld [vmem:[#allocation20_spill] sm:$0xff] }
 0x2ce   :  { %6669 = vst.msk [vmem:[#allocation5 + $0x60] sm:$0xff] %vm6656_vm1, %v6539_v31  ;;  %v6557_v36 = vadd.f32 %v7965_v59, %v6298_v1  ;;  %v6292_v42 = vadd.f32 %v6291_v48, %v5995_v8  ;;  %v9645_v1 = vld [vmem:[#allocation30_spill] sm:$0xff]  ;;  %v9663_v44 = vld [vmem:[#allocation43_spill] sm:$0xff]  ;;  %v9666_v2 = vld [vmem:[#allocation45_spill] sm:$0xff] }
 0x2cf   :  { %v7916_v15 = vpop.f32.mrf.mxu0  ;;  %v7974_v41 = vpop.f32.mrf.mxu1 }
 0x2d0   :  { %6672 = vst.msk [vmem:[#allocation5 + $0x78] sm:$0xff] %vm6656_vm1, %v6557_v36  ;;  %v6551_v25 = vadd.f32 %v6550_v63, %v6292_v42  ;;  %v6310_v7 = vadd.f32 %v7916_v15, %v6019_v28  ;;  %v9638_v63 = vld [vmem:[#allocation38_spill] sm:$0xff]  ;;  %v9648_v42 = vld [vmem:[#allocation32_spill] sm:$0xff]  ;;  %v9649_v15 = vld [vmem:[#allocation17_spill] sm:$0xff] }
 0x2d1   :  { %v6303_v6 = vpop.f32.mrf.mxu0  ;;  %v6586_v10 = vpop.f32.mrf.mxu1  ;;  %v5752_v18 = vadd.f32 %v9638_v63, %v9637_v4  ;;  %v6059_v19 = vadd.f32 %v9648_v42, %v5745_v14  ;;  %v5780_v45 = vadd.f32 %v9650_v52, %v9649_v15 }
 0x2d2   :  { %6671 = vst.msk [vmem:[#allocation5 + $0x70] sm:$0xff] %vm6656_vm1, %v6551_v25  ;;  %v6569_v11 = vadd.f32 %v7968_v61, %v6310_v7  ;;  %v6304_v13 = vadd.f32 %v6303_v6, %v6011_v50  ;;  %v9651_v25 = vld [vmem:[#allocation35_spill] sm:$0xff]  ;;  %v9652_v6 = vld [vmem:[#allocation16_spill] sm:$0xff] }
 0x2d3   :  { %v7919_v60 = vpop.f32.mrf.mxu0  ;;  %v7977_v21 = vpop.f32.mrf.mxu1  ;;  %v6067_v24 = vadd.f32 %v9645_v1, %v5752_v18  ;;  %v6083_v7 = vadd.f32 %v9651_v25, %v5766_v23  ;;  %v5773_v62 = vadd.f32 %v9653_v30, %v9652_v6  ;;  %v9660_v18 = vld [vmem:[#allocation41_spill] sm:$0xff] }
 0x2d4   :  { %6674 = vst.msk [vmem:[#allocation5 + $0x88] sm:$0xff] %vm6656_vm1, %v6569_v11  ;;  %v6563_v3 = vadd.f32 %v6562_v22, %v6304_v13  ;;  %v6322_v59 = vadd.f32 %v7919_v60, %v6035_v56  ;;  %v9654_v11 = vld [vmem:[#allocation37_spill] sm:$0xff]  ;;  %v9655_v56 = vld [vmem:[#allocation19_spill] sm:$0xff]  ;;  %v9656_v60 = vld [vmem:[#allocation50_spill] sm:$0xff] }
 0x2d5   :  { %v6315_v32 = vpop.f32.mrf.mxu0  ;;  %v6598_v12 = vpop.f32.mrf.mxu1  ;;  %v6075_v13 = vadd.f32 %v9654_v11, %v5759_v37  ;;  %v5794_v57 = vadd.f32 %v9656_v60, %v9655_v56 }
 0x2d6   :  { %6673 = vst.msk [vmem:[#allocation5 + $0x80] sm:$0xff] %vm6656_vm1, %v6563_v3  ;;  %v6581_v58 = vadd.f32 %v7971_v49, %v6322_v59  ;;  %v6316_v39 = vadd.f32 %v6315_v32, %v6027_v0  ;;  %v6099_v3 = vadd.f32 %v9657_v26, %v5780_v45  ;;  %v9658_v0 = vld [vmem:[#allocation18_spill] sm:$0xff]  ;;  %v9659_v32 = vld [vmem:[#allocation51_spill] sm:$0xff] }
 0x2d7   :  { %v7922_v61 = vpop.f32.mrf.mxu0  ;;  %v7980_v17 = vpop.f32.mrf.mxu1  ;;  %v5787_v4 = vadd.f32 %v9659_v32, %v9658_v0  ;;  %v6115_v14 = vadd.f32 %v9663_v44, %v5794_v57 }
 0x2d8   :  { %6676 = vst.msk [vmem:[#allocation5 + $0x98] sm:$0xff] %vm6656_vm1, %v6581_v58  ;;  %v6575_v29 = vadd.f32 %v6574_v5, %v6316_v39  ;;  %v6334_v22 = vadd.f32 %v7922_v61, %v6051_v46  ;;  %v6091_v58 = vadd.f32 %v9660_v18, %v5773_v62  ;;  %v9662_v46 = vld [vmem:[#allocation52_spill] sm:$0xff] }
 0x2d9   :  { %v6327_v51 = vpop.f32.mrf.mxu0  ;;  %v6610_v47 = vpop.f32.mrf.mxu1  ;;  %v5808_v61 = vadd.f32 %v9662_v46, %v9661_v33  ;;  %v6107_v23 = vadd.f32 %v9666_v2, %v5787_v4 }
 0x2da   :  { %6675 = vst.msk [vmem:[#allocation5 + $0x90] sm:$0xff] %vm6656_vm1, %v6575_v29  ;;  %v6593_v49 = vadd.f32 %v7974_v41, %v6334_v22  ;;  %v6328_v31 = vadd.f32 %v6327_v51, %v6043_v55  ;;  %v9665_v55 = vld [vmem:[#allocation53_spill] sm:$0xff] }
 0x2db   :  { %v7925_v8 = vpop.f32.mrf.mxu0  ;;  %v7983_v48 = vpop.f32.mrf.mxu1  ;;  %v5801_v51 = vadd.f32 %v9665_v55, %v9664_v16 }
 0x2dc   :  { %6678 = vst.msk [vmem:[#allocation5 + $0xa8] sm:$0xff] %vm6656_vm1, %v6593_v49  ;;  %v6587_v5 = vadd.f32 %v6586_v10, %v6328_v31  ;;  %v6346_v36 = vadd.f32 %v7925_v8, %v6067_v24  ;;  %v9667_v24 = vld [vmem:[#allocation47_spill] sm:$0xff] }
 0x2dd   :  { %v6339_v28 = vpop.f32.mrf.mxu0  ;;  %v6622_v35 = vpop.f32.mrf.mxu1  ;;  %v6131_v8 = vadd.f32 %v9667_v24, %v5808_v61 }
 0x2de   :  { %6677 = vst.msk [vmem:[#allocation5 + $0xa0] sm:$0xff] %vm6656_vm1, %v6587_v5  ;;  %v6605_v41 = vadd.f32 %v7977_v21, %v6346_v36  ;;  %v6340_v43 = vadd.f32 %v6339_v28, %v6059_v19  ;;  %v9668_v5 = vld [vmem:[#allocation49_spill] sm:$0xff] }
 0x2df   :  { %v7928_v50 = vpop.f32.mrf.mxu0  ;;  %v7986_v59 = vpop.f32.mrf.mxu1  ;;  %v6123_v36 = vadd.f32 %v9668_v5, %v5801_v51 }
 0x2e0   :  { %6680 = vst.msk [vmem:[#allocation5 + $0xb8] sm:$0xff] %vm6656_vm1, %v6605_v41  ;;  %v6599_v10 = vadd.f32 %v6598_v12, %v6340_v43  ;;  %v6358_v53 = vadd.f32 %v7928_v50, %v6083_v7 }
 0x2e1   :  { %v6351_v34 = vpop.f32.mrf.mxu0  ;;  %v6634_v29 = vpop.f32.mrf.mxu1 }
 0x2e2   :  { %6679 = vst.msk [vmem:[#allocation5 + $0xb0] sm:$0xff] %vm6656_vm1, %v6599_v10  ;;  %v6617_v21 = vadd.f32 %v7980_v17, %v6358_v53  ;;  %v6352_v9 = vadd.f32 %v6351_v34, %v6075_v13 }
 0x2e3   :  { %v7931_v38 = vpop.f32.mrf.mxu0 }
 0x2e4   :  { %6682 = vst.msk [vmem:[#allocation5 + $0xc8] sm:$0xff] %vm6656_vm1, %v6617_v21  ;;  %v6611_v12 = vadd.f32 %v6610_v47, %v6352_v9  ;;  %v6370_v63 = vadd.f32 %v7931_v38, %v6099_v3 }
 0x2e5   :  { %v6363_v39 = vpop.f32.mrf.mxu0 }
 0x2e6   :  { %6681 = vst.msk [vmem:[#allocation5 + $0xc0] sm:$0xff] %vm6656_vm1, %v6611_v12  ;;  %v6629_v17 = vadd.f32 %v7983_v48, %v6370_v63  ;;  %v6364_v27 = vadd.f32 %v6363_v39, %v6091_v58  ;;  %v7989_v48 = vpop.f32.mrf.mxu1 }
 0x2e7   :  { %v7934_v22 = vpop.f32.mrf.mxu0 }
 0x2e8   :  { %6684 = vst.msk [vmem:[#allocation5 + $0xd8] sm:$0xff] %vm6656_vm1, %v6629_v17  ;;  %v6623_v47 = vadd.f32 %v6622_v35, %v6364_v27  ;;  %v6382_v40 = vadd.f32 %v7934_v22, %v6115_v14  ;;  %v6646_v15 = vpop.f32.mrf.mxu1 }
 0x2e9   :  { %v6375_v49 = vpop.f32.mrf.mxu0 }
 0x2ea   :  { %6683 = vst.msk [vmem:[#allocation5 + $0xd0] sm:$0xff] %vm6656_vm1, %v6623_v47  ;;  %v6641_v31 = vadd.f32 %v7986_v59, %v6382_v40  ;;  %v6376_v1 = vadd.f32 %v6375_v49, %v6107_v23 }
 0x2eb   :  { %v7937_v54 = vpop.f32.mrf.mxu0 }
 0x2ec   :  { %6686 = vst.msk [vmem:[#allocation5 + $0xe8] sm:$0xff] %vm6656_vm1, %v6641_v31  ;;  %v6635_v20 = vadd.f32 %v6634_v29, %v6376_v1  ;;  %v6394_v37 = vadd.f32 %v7937_v54, %v6131_v8 }
 0x2ed   :  { %v6387_v42 = vpop.f32.mrf.mxu0 }
 0x2ee   :  { %6685 = vst.msk [vmem:[#allocation5 + $0xe0] sm:$0xff] %vm6656_vm1, %v6635_v20  ;;  %v6653_v19 = vadd.f32 %v7989_v48, %v6394_v37  ;;  %v6388_v28 = vadd.f32 %v6387_v42, %v6123_v36 }
 0x2f0   :  { %6688 = vst.msk [vmem:[#allocation5 + $0xf8] sm:$0xff] %vm6656_vm1, %v6653_v19  ;;  %v6647_v52 = vadd.f32 %v6646_v15, %v6388_v28 }
 0x2f2   :  { %6687 = vst.msk [vmem:[#allocation5 + $0xf0] sm:$0xff] %vm6656_vm1, %v6647_v52 }
 0x2f3   :  { %8025 = shalt.err (!%p8022_p9)
}
 0x2f4   :  { %6700 = dma.vmem_to_hbm [thread:$0]  %s6695_s29, 4096, %s9416_s3, [#allocation4], %s8039_s15, %s8039_s15, %s8040_s16  }
 0x2f5   :  { %8036 = dma.done.wait [#allocation4], 4096  }
 0x2f6   :  { %8037 = vsyncadd [#allocation4], 4294963200 }
 0x2f7   :  { %6704 = vsyncpa [#allocation3], 1 }
 0x2f8   :  { %6705 = vsyncpa [#allocation4], 1 }

</bundles_post_ra>
